<compile_context>
chip_gen: v7x
topology: tpu7x:2x2x1
jax: 0.10.0
libtpu: 0.0.40
codegen_flags: <defaults>
</compile_context>

<pallas_src>
import jax
import jax.numpy as jnp
from jax.experimental import pallas as pl
from jax.experimental.pallas import tpu as pltpu


# ----------------------------------------------------------------------------
# Kernel factory (closes over static seq_len / tile_n)
# ----------------------------------------------------------------------------
def _make_kernel(seq_len, tile_n):
    L = seq_len

    def shifted(h, T):
        """Zero-padded +/-1 time shifts of h=(tile_n*T, C); time on sublanes.

        The roll wraps rows across sample boundaries, but exactly those rows
        (t == 0 for prev, t == T-1 for next) are masked to zero, which also
        implements the conv's 'same' zero padding."""
        rows, C = h.shape
        t = jax.lax.broadcasted_iota(jnp.int32, (rows, C), 0) % T
        h_prev = jnp.where(t == 0, 0.0, pltpu.roll(h, shift=1, axis=0))
        h_next = jnp.where(t == T - 1, 0.0,
                           pltpu.roll(h, shift=rows - 1, axis=0))
        return h_prev, h_next

    def conv_fused(h, T, w_flat, b):
        """3-tap conv as a single matmul: im2col along the lane axis."""
        h_prev, h_next = shifted(h, T)
        a = jnp.concatenate([h_prev, h, h_next], axis=-1)       # (rows, 3*Cin)
        z = jnp.dot(a.astype(jnp.bfloat16), w_flat,             # bf16 MXU
                    preferred_element_type=jnp.float32) + b
        return jnp.maximum(z, 0.0)

    def maxpool2(h):
        """MaxPool1d(kernel=2, stride=2) along time (single vectorized max)."""
        rows, C = h.shape
        return jnp.max(h.reshape(rows // 2, 2, C), axis=1)

    def kernel(x_ref, w1_ref, b1_ref, w2_ref, b2_ref, w3_ref, b3_ref,
               we_ref, be_ref, out_ref):
        # ---- conv1 (Cin=1): 3 broadcast FMAs on the VPU, no matmul ----------
        x = x_ref[...]                                   # (tile_n*L, 1) f32
        x_prev, x_next = shifted(x, L)
        w1 = w1_ref[...]                                 # (3, 32) f32
        h = (x_prev * w1[0:1, :] + x * w1[1:2, :] + x_next * w1[2:3, :]
             + b1_ref[...])
        h = jnp.maximum(h, 0.0)                          # (tile_n*L, 32)
        h = maxpool2(h)                                  # (tile_n*L/2, 32)

        # ---- conv2 / conv3: fused-tap bf16 MXU matmuls ----------------------
        h = conv_fused(h, L // 2, w2_ref[...], b2_ref[...])   # (., 64)
        h = maxpool2(h)                                       # (tile_n*L/4, 64)
        h = conv_fused(h, L // 4, w3_ref[...], b3_ref[...])   # (., 128)

        # ---- AdaptiveAvgPool1d(1) + Flatten ---------------------------------
        # Sum over time; the 1/T scale is folded into we_ref in the wrapper.
        T3 = L // 4
        feat = jnp.sum(h.reshape(tile_n, T3, h.shape[-1]), axis=1)  # (tile_n,128)

        # ---- Embedding linear ----------------------------------------------
        # TODO(synk): nn.Dropout(0.5) is identity at inference time; omitted.
        emb = jnp.dot(feat.astype(jnp.bfloat16), we_ref[...],
                      preferred_element_type=jnp.float32) + be_ref[...]

        # ---- F.normalize(p=2, dim=1), eps=1e-12 -----------------------------
        # x / max(||x||, eps) == x * rsqrt(max(||x||^2, eps^2))  (EUP rsqrt).
        sumsq = jnp.sum(emb * emb, axis=1, keepdims=True)
        inv = jax.lax.rsqrt(jnp.maximum(sumsq, 1e-24))
        out_ref[...] = emb * inv

    return kernel


# ----------------------------------------------------------------------------
# Wrapper
# ----------------------------------------------------------------------------
def siamese_pallas(x_ncl, params_k, *, tile_n=8):
    """x_ncl: (N, 1, L) float32 — stacked (anchor|positive|negative) batch."""
    N, _, L = x_ncl.shape
    assert L % 4 == 0, "two MaxPool1d(2) stages need L % 4 == 0"
    w1, b1, w2, b2, w3, b3, wE, bE = params_k
    emb_dim = wE.shape[1]

    # Pad the batch to a multiple of tile_n so every block is (8,128)-aligned.
    n_pad = (-N) % tile_n
    x_p = jnp.pad(x_ncl, ((0, n_pad), (0, 0), (0, 0)))
    Np = N + n_pad
    x_flat = x_p.reshape(Np * L, 1)          # time on sublanes, Cin=1 on lanes

    kernel = _make_kernel(L, tile_n)
    grid = (Np // tile_n,)

    out = pl.pallas_call(
        kernel,
        out_shape=jax.ShapeDtypeStruct((Np, emb_dim), jnp.float32),
        grid=grid,
        in_specs=[
            pl.BlockSpec((tile_n * L, 1), lambda i: (i, 0)),   # x (batch-tiled)
            pl.BlockSpec(w1.shape, lambda i: (0, 0)),
            pl.BlockSpec(b1.shape, lambda i: (0, 0)),
            pl.BlockSpec(w2.shape, lambda i: (0, 0)),
            pl.BlockSpec(b2.shape, lambda i: (0, 0)),
            pl.BlockSpec(w3.shape, lambda i: (0, 0)),
            pl.BlockSpec(b3.shape, lambda i: (0, 0)),
            pl.BlockSpec(wE.shape, lambda i: (0, 0)),
            pl.BlockSpec(bE.shape, lambda i: (0, 0)),
        ],
        out_specs=pl.BlockSpec((tile_n, emb_dim), lambda i: (i, 0)),
        compiler_params=pltpu.CompilerParams(
            dimension_semantics=("parallel",)),
    )(x_flat, w1, b1, w2, b2, w3, b3, wE, bE)
    return out[:N]


# ----------------------------------------------------------------------------
# Deterministic parameter init (PyTorch layouts), then kernel-layout convert.
# ----------------------------------------------------------------------------
def init_params(key, embedding_dim=128):
    ks = jax.random.split(key, 8)

    def u(k, shape, fan_in):
        bound = 1.0 / jnp.sqrt(jnp.float32(fan_in))
        return jax.random.uniform(k, shape, jnp.float32, -bound, bound)

    w1_t = u(ks[0], (32, 1, 3), 1 * 3);    b1 = u(ks[1], (32,), 1 * 3)
    w2_t = u(ks[2], (64, 32, 3), 32 * 3);  b2 = u(ks[3], (64,), 32 * 3)
    w3_t = u(ks[4], (128, 64, 3), 64 * 3); b3 = u(ks[5], (128,), 64 * 3)
    wE_t = u(ks[6], (embedding_dim, 128), 128)
    bE = u(ks[7], (embedding_dim,), 128)
    return (w1_t, b1, w2_t, b2, w3_t, b3, wE_t, bE)


def to_kernel_params(params_t, pool_len):
    """PyTorch layouts -> kernel layouts (fused-tap, bf16 matmul weights)."""
    w1_t, b1, w2_t, b2, w3_t, b3, wE_t, bE = params_t
    # conv1 stays f32 (VPU path): (Cout=32, 1, 3) -> (3, 32)
    w1 = jnp.transpose(w1_t, (2, 1, 0)).reshape(3, 32)
    # conv2/conv3: (Cout, Cin, 3) -> (3, Cin, Cout) -> (3*Cin, Cout), bf16
    w2 = jnp.transpose(w2_t, (2, 1, 0)).reshape(3 * 32, 64).astype(jnp.bfloat16)
    w3 = jnp.transpose(w3_t, (2, 1, 0)).reshape(3 * 64, 128).astype(jnp.bfloat16)
    # embedding: (emb, 128) -> (128, emb); fold the avgpool 1/T scale in, bf16
    wE = (wE_t.T / float(pool_len)).astype(jnp.bfloat16)
    return (w1, b1[None, :], w2, b2[None, :], w3, b3[None, :], wE, bE[None, :])


# ----------------------------------------------------------------------------
# Pure-JAX reference (independent path, NCL layout like PyTorch, f32)
# ----------------------------------------------------------------------------
def ref_forward(x_ncl, params_t):
    w1_t, b1, w2_t, b2, w3_t, b3, wE_t, bE = params_t

    def conv(x, w, b):
        y = jax.lax.conv_general_dilated(
            x, w, window_strides=(1,), padding=((1, 1),),
            dimension_numbers=('NCH', 'OIH', 'NCH'))
        return jax.nn.relu(y + b[None, :, None])

    def maxpool(x):
        return jax.lax.reduce_window(x, -jnp.inf, jax.lax.max,
                                     (1, 1, 2), (1, 1, 2), 'VALID')

    h = maxpool(conv(x_ncl, w1_t, b1))
    h = maxpool(conv(h, w2_t, b2))
    h = conv(h, w3_t, b3)
    feat = jnp.mean(h, axis=2)                 # AdaptiveAvgPool1d(1) + Flatten
    emb = feat @ wE_t.T + bE
    norm = jnp.sqrt(jnp.sum(emb * emb, axis=1, keepdims=True))
    return emb / jnp.maximum(norm, 1e-12)


if __name__ == "__main__":
    key = jax.random.PRNGKey(0)
    kp, ka, kpos, kn = jax.random.split(key, 4)

    B, L = 4, 16
    anchor = jax.random.normal(ka, (B, 1, L), jnp.float32)
    positive = jax.random.normal(kpos, (B, 1, L), jnp.float32)
    negative = jax.random.normal(kn, (B, 1, L), jnp.float32)

    params_t = init_params(kp, embedding_dim=128)
    params_k = to_kernel_params(params_t, pool_len=L // 4)

    # Shared weights: stack the three branches along the batch axis.
    x = jnp.concatenate([anchor, positive, negative], axis=0)   # (3B, 1, L)

    emb = siamese_pallas(x, params_k, tile_n=8)                 # grid=(2,)
    emb = jax.block_until_ready(emb)

    a_emb, p_emb, n_emb = jnp.split(emb, 3, axis=0)

    ref = ref_forward(x, params_t)
    assert emb.shape == (3 * B, 128) and a_emb.shape == (B, 128)
    assert bool(jnp.all(jnp.isfinite(emb)))
    assert bool(jnp.allclose(emb, ref, atol=2e-2, rtol=2e-2)), "mismatch vs reference"

    print("KERNEL_OK")
</pallas_src>

<mosaic_0001>
module attributes {stable_mosaic.version = 11 : i64} {
  func.func @kernel(%arg0: i32, %arg1: memref<128x1xf32, #tpu.memory_space<vmem>>, %arg2: memref<3x32xf32, #tpu.memory_space<vmem>>, %arg3: memref<1x32xf32, #tpu.memory_space<vmem>>, %arg4: memref<96x64xbf16, #tpu.memory_space<vmem>>, %arg5: memref<1x64xf32, #tpu.memory_space<vmem>>, %arg6: memref<192x128xbf16, #tpu.memory_space<vmem>>, %arg7: memref<1x128xf32, #tpu.memory_space<vmem>>, %arg8: memref<128x128xbf16, #tpu.memory_space<vmem>>, %arg9: memref<1x128xf32, #tpu.memory_space<vmem>>, %arg10: memref<8x128xf32, #tpu.memory_space<vmem>>) attributes {dimension_semantics = [#tpu.dimension_semantics<parallel>], iteration_bounds = array<i64: 2>, scalar_prefetch = 0 : i64, scratch_operands = 0 : i64, tpu.core_type = #tpu.core_type<tc>, window_params = [{transform_indices = @transform_0, window_bounds = array<i64: 128, 1>}, {pipeline_mode = #tpu.pipeline_mode<synchronous>, transform_indices = @transform_1, window_bounds = array<i64: 3, 32>}, {pipeline_mode = #tpu.pipeline_mode<synchronous>, transform_indices = @transform_2, window_bounds = array<i64: 1, 32>}, {pipeline_mode = #tpu.pipeline_mode<synchronous>, transform_indices = @transform_3, window_bounds = array<i64: 96, 64>}, {pipeline_mode = #tpu.pipeline_mode<synchronous>, transform_indices = @transform_4, window_bounds = array<i64: 1, 64>}, {pipeline_mode = #tpu.pipeline_mode<synchronous>, transform_indices = @transform_5, window_bounds = array<i64: 192, 128>}, {pipeline_mode = #tpu.pipeline_mode<synchronous>, transform_indices = @transform_6, window_bounds = array<i64: 1, 128>}, {pipeline_mode = #tpu.pipeline_mode<synchronous>, transform_indices = @transform_7, window_bounds = array<i64: 128, 128>}, {pipeline_mode = #tpu.pipeline_mode<synchronous>, transform_indices = @transform_8, window_bounds = array<i64: 1, 128>}, {transform_indices = @transform_9, window_bounds = array<i64: 8, 128>}]} {
    %c0 = arith.constant 0 : index
    %c0_0 = arith.constant 0 : index
    %0 = vector.load %arg1[%c0, %c0_0] : memref<128x1xf32, #tpu.memory_space<vmem>>, vector<128x1xf32>
    %1 = tpu.iota {dimensions = array<i32: 0>} : vector<128x1xi32>
    %c16_i32 = arith.constant 16 : i32
    %c0_i32 = arith.constant 0 : i32
    %2 = arith.cmpi eq, %c16_i32, %c0_i32 : i32
    %c1_i32 = arith.constant 1 : i32
    %3 = arith.select %2, %c1_i32, %c16_i32 : i32
    %4 = vector.broadcast %3 : i32 to vector<128x1xi32>
    %5 = arith.remsi %1, %4 : vector<128x1xi32>
    %c0_i32_1 = arith.constant 0 : i32
    %6 = vector.broadcast %c0_i32_1 : i32 to vector<128x1xi32>
    %7 = arith.cmpi ne, %5, %6 : vector<128x1xi32>
    %c0_i32_2 = arith.constant 0 : i32
    %8 = vector.broadcast %c0_i32_2 : i32 to vector<128x1xi32>
    %9 = arith.cmpi slt, %5, %8 : vector<128x1xi32>
    %c0_i32_3 = arith.constant 0 : i32
    %10 = arith.cmpi slt, %3, %c0_i32_3 : i32
    %11 = vector.broadcast %10 : i1 to vector<128x1xi1>
    %12 = vector.broadcast %11 : vector<128x1xi1> to vector<128x1xi1>
    %13 = arith.xori %9, %12 : vector<128x1xi1>
    %14 = arith.andi %13, %7 : vector<128x1xi1>
    %15 = vector.broadcast %3 : i32 to vector<128x1xi32>
    %16 = arith.addi %5, %15 : vector<128x1xi32>
    %17 = arith.select %14, %16, %5 : vector<128x1xi1>, vector<128x1xi32>
    %c0_i32_4 = arith.constant 0 : i32
    %18 = vector.broadcast %c0_i32_4 : i32 to vector<128x1xi32>
    %19 = arith.cmpi eq, %17, %18 : vector<128x1xi32>
    %c1_i32_5 = arith.constant 1 : i32
    %20 = tpu.dynamic_rotate %0 by %c1_i32_5 dim 0 : vector<128x1xf32>, i32 -> vector<128x1xf32>
    %cst = arith.constant 0.000000e+00 : f32
    %21 = vector.broadcast %cst : f32 to vector<128x1xf32>
    %22 = arith.select %19, %21, %20 : vector<128x1xi1>, vector<128x1xf32>
    %c15_i32 = arith.constant 15 : i32
    %23 = vector.broadcast %c15_i32 : i32 to vector<128x1xi32>
    %24 = arith.cmpi eq, %17, %23 : vector<128x1xi32>
    %c127_i32 = arith.constant 127 : i32
    %25 = tpu.dynamic_rotate %0 by %c127_i32 dim 0 : vector<128x1xf32>, i32 -> vector<128x1xf32>
    %cst_6 = arith.constant 0.000000e+00 : f32
    %26 = vector.broadcast %cst_6 : f32 to vector<128x1xf32>
    %27 = arith.select %24, %26, %25 : vector<128x1xi1>, vector<128x1xf32>
    %c0_7 = arith.constant 0 : index
    %c0_8 = arith.constant 0 : index
    %28 = vector.load %arg2[%c0_7, %c0_8] : memref<3x32xf32, #tpu.memory_space<vmem>>, vector<3x32xf32>
    %29 = vector.extract_strided_slice %28 {offsets = [0, 0], sizes = [1, 32], strides = [1, 1]} : vector<3x32xf32> to vector<1x32xf32>
    %30 = vector.broadcast %22 : vector<128x1xf32> to vector<128x32xf32>
    %31 = vector.broadcast %29 : vector<1x32xf32> to vector<128x32xf32>
    %32 = arith.mulf %30, %31 : vector<128x32xf32>
    %33 = vector.extract_strided_slice %28 {offsets = [1, 0], sizes = [1, 32], strides = [1, 1]} : vector<3x32xf32> to vector<1x32xf32>
    %34 = vector.broadcast %0 : vector<128x1xf32> to vector<128x32xf32>
    %35 = vector.broadcast %33 : vector<1x32xf32> to vector<128x32xf32>
    %36 = arith.mulf %34, %35 : vector<128x32xf32>
    %37 = arith.addf %32, %36 : vector<128x32xf32>
    %38 = vector.extract_strided_slice %28 {offsets = [2, 0], sizes = [1, 32], strides = [1, 1]} : vector<3x32xf32> to vector<1x32xf32>
    %39 = vector.broadcast %27 : vector<128x1xf32> to vector<128x32xf32>
    %40 = vector.broadcast %38 : vector<1x32xf32> to vector<128x32xf32>
    %41 = arith.mulf %39, %40 : vector<128x32xf32>
    %42 = arith.addf %37, %41 : vector<128x32xf32>
    %c0_9 = arith.constant 0 : index
    %c0_10 = arith.constant 0 : index
    %43 = vector.load %arg3[%c0_9, %c0_10] : memref<1x32xf32, #tpu.memory_space<vmem>>, vector<1x32xf32>
    %44 = vector.broadcast %43 : vector<1x32xf32> to vector<128x32xf32>
    %45 = arith.addf %42, %44 : vector<128x32xf32>
    %cst_11 = arith.constant 0.000000e+00 : f32
    %46 = vector.broadcast %cst_11 : f32 to vector<128x32xf32>
    %47 = arith.maximumf %45, %46 : vector<128x32xf32>
    %48 = vector.shape_cast %47 : vector<128x32xf32> to vector<64x2x32xf32>
    %cst_12 = arith.constant dense<0xFF800000> : vector<64x32xf32>
    %49 = vector.multi_reduction <maximumf>, %48, %cst_12 [1] : vector<64x2x32xf32> to vector<64x32xf32>
    %c0_13 = arith.constant 0 : index
    %c0_14 = arith.constant 0 : index
    %50 = vector.load %arg4[%c0_13, %c0_14] : memref<96x64xbf16, #tpu.memory_space<vmem>>, vector<96x64xbf16>
    %c0_15 = arith.constant 0 : index
    %c0_16 = arith.constant 0 : index
    %51 = vector.load %arg5[%c0_15, %c0_16] : memref<1x64xf32, #tpu.memory_space<vmem>>, vector<1x64xf32>
    %52 = tpu.iota {dimensions = array<i32: 0>} : vector<64x32xi32>
    %c8_i32 = arith.constant 8 : i32
    %c0_i32_17 = arith.constant 0 : i32
    %53 = arith.cmpi eq, %c8_i32, %c0_i32_17 : i32
    %c1_i32_18 = arith.constant 1 : i32
    %54 = arith.select %53, %c1_i32_18, %c8_i32 : i32
    %55 = vector.broadcast %54 : i32 to vector<64x32xi32>
    %56 = arith.remsi %52, %55 : vector<64x32xi32>
    %c0_i32_19 = arith.constant 0 : i32
    %57 = vector.broadcast %c0_i32_19 : i32 to vector<64x32xi32>
    %58 = arith.cmpi ne, %56, %57 : vector<64x32xi32>
    %c0_i32_20 = arith.constant 0 : i32
    %59 = vector.broadcast %c0_i32_20 : i32 to vector<64x32xi32>
    %60 = arith.cmpi slt, %56, %59 : vector<64x32xi32>
    %c0_i32_21 = arith.constant 0 : i32
    %61 = arith.cmpi slt, %54, %c0_i32_21 : i32
    %62 = vector.broadcast %61 : i1 to vector<64x32xi1>
    %63 = vector.broadcast %62 : vector<64x32xi1> to vector<64x32xi1>
    %64 = arith.xori %60, %63 : vector<64x32xi1>
    %65 = arith.andi %64, %58 : vector<64x32xi1>
    %66 = vector.broadcast %54 : i32 to vector<64x32xi32>
    %67 = arith.addi %56, %66 : vector<64x32xi32>
    %68 = arith.select %65, %67, %56 : vector<64x32xi1>, vector<64x32xi32>
    %c0_i32_22 = arith.constant 0 : i32
    %69 = vector.broadcast %c0_i32_22 : i32 to vector<64x32xi32>
    %70 = arith.cmpi eq, %68, %69 : vector<64x32xi32>
    %c1_i32_23 = arith.constant 1 : i32
    %71 = tpu.dynamic_rotate %49 by %c1_i32_23 dim 0 : vector<64x32xf32>, i32 -> vector<64x32xf32>
    %cst_24 = arith.constant 0.000000e+00 : f32
    %72 = vector.broadcast %cst_24 : f32 to vector<64x32xf32>
    %73 = arith.select %70, %72, %71 : vector<64x32xi1>, vector<64x32xf32>
    %c7_i32 = arith.constant 7 : i32
    %74 = vector.broadcast %c7_i32 : i32 to vector<64x32xi32>
    %75 = arith.cmpi eq, %68, %74 : vector<64x32xi32>
    %c63_i32 = arith.constant 63 : i32
    %76 = tpu.dynamic_rotate %49 by %c63_i32 dim 0 : vector<64x32xf32>, i32 -> vector<64x32xf32>
    %cst_25 = arith.constant 0.000000e+00 : f32
    %77 = vector.broadcast %cst_25 : f32 to vector<64x32xf32>
    %78 = arith.select %75, %77, %76 : vector<64x32xi1>, vector<64x32xf32>
    %79 = tpu.concatenate %73, %49, %78 in 1 : vector<64x32xf32>, vector<64x32xf32>, vector<64x32xf32> -> vector<64x96xf32>
    %80 = arith.truncf %79 : vector<64x96xf32> to vector<64x96xbf16>
    %cst_26 = arith.constant dense<0.000000e+00> : vector<64x64xf32>
    %81 = tpu.matmul %80, %50, %cst_26 {dimension_numbers = #tpu.dot_dimension_numbers<[1], [0], [0], [1], [0, 0, 1, 1], [], []>} : vector<64x96xbf16>, vector<96x64xbf16>, vector<64x64xf32> -> vector<64x64xf32>
    %82 = vector.broadcast %51 : vector<1x64xf32> to vector<64x64xf32>
    %83 = arith.addf %81, %82 : vector<64x64xf32>
    %cst_27 = arith.constant 0.000000e+00 : f32
    %84 = vector.broadcast %cst_27 : f32 to vector<64x64xf32>
    %85 = arith.maximumf %83, %84 : vector<64x64xf32>
    %86 = vector.shape_cast %85 : vector<64x64xf32> to vector<32x2x64xf32>
    %cst_28 = arith.constant dense<0xFF800000> : vector<32x64xf32>
    %87 = vector.multi_reduction <maximumf>, %86, %cst_28 [1] : vector<32x2x64xf32> to vector<32x64xf32>
    %c0_29 = arith.constant 0 : index
    %c0_30 = arith.constant 0 : index
    %88 = vector.load %arg6[%c0_29, %c0_30] : memref<192x128xbf16, #tpu.memory_space<vmem>>, vector<192x128xbf16>
    %c0_31 = arith.constant 0 : index
    %c0_32 = arith.constant 0 : index
    %89 = vector.load %arg7[%c0_31, %c0_32] : memref<1x128xf32, #tpu.memory_space<vmem>>, vector<1x128xf32>
    %90 = tpu.iota {dimensions = array<i32: 0>} : vector<32x64xi32>
    %c4_i32 = arith.constant 4 : i32
    %c0_i32_33 = arith.constant 0 : i32
    %91 = arith.cmpi eq, %c4_i32, %c0_i32_33 : i32
    %c1_i32_34 = arith.constant 1 : i32
    %92 = arith.select %91, %c1_i32_34, %c4_i32 : i32
    %93 = vector.broadcast %92 : i32 to vector<32x64xi32>
    %94 = arith.remsi %90, %93 : vector<32x64xi32>
    %c0_i32_35 = arith.constant 0 : i32
    %95 = vector.broadcast %c0_i32_35 : i32 to vector<32x64xi32>
    %96 = arith.cmpi ne, %94, %95 : vector<32x64xi32>
    %c0_i32_36 = arith.constant 0 : i32
    %97 = vector.broadcast %c0_i32_36 : i32 to vector<32x64xi32>
    %98 = arith.cmpi slt, %94, %97 : vector<32x64xi32>
    %c0_i32_37 = arith.constant 0 : i32
    %99 = arith.cmpi slt, %92, %c0_i32_37 : i32
    %100 = vector.broadcast %99 : i1 to vector<32x64xi1>
    %101 = vector.broadcast %100 : vector<32x64xi1> to vector<32x64xi1>
    %102 = arith.xori %98, %101 : vector<32x64xi1>
    %103 = arith.andi %102, %96 : vector<32x64xi1>
    %104 = vector.broadcast %92 : i32 to vector<32x64xi32>
    %105 = arith.addi %94, %104 : vector<32x64xi32>
    %106 = arith.select %103, %105, %94 : vector<32x64xi1>, vector<32x64xi32>
    %c0_i32_38 = arith.constant 0 : i32
    %107 = vector.broadcast %c0_i32_38 : i32 to vector<32x64xi32>
    %108 = arith.cmpi eq, %106, %107 : vector<32x64xi32>
    %c1_i32_39 = arith.constant 1 : i32
    %109 = tpu.dynamic_rotate %87 by %c1_i32_39 dim 0 : vector<32x64xf32>, i32 -> vector<32x64xf32>
    %cst_40 = arith.constant 0.000000e+00 : f32
    %110 = vector.broadcast %cst_40 : f32 to vector<32x64xf32>
    %111 = arith.select %108, %110, %109 : vector<32x64xi1>, vector<32x64xf32>
    %c3_i32 = arith.constant 3 : i32
    %112 = vector.broadcast %c3_i32 : i32 to vector<32x64xi32>
    %113 = arith.cmpi eq, %106, %112 : vector<32x64xi32>
    %c31_i32 = arith.constant 31 : i32
    %114 = tpu.dynamic_rotate %87 by %c31_i32 dim 0 : vector<32x64xf32>, i32 -> vector<32x64xf32>
    %cst_41 = arith.constant 0.000000e+00 : f32
    %115 = vector.broadcast %cst_41 : f32 to vector<32x64xf32>
    %116 = arith.select %113, %115, %114 : vector<32x64xi1>, vector<32x64xf32>
    %117 = tpu.concatenate %111, %87, %116 in 1 : vector<32x64xf32>, vector<32x64xf32>, vector<32x64xf32> -> vector<32x192xf32>
    %118 = arith.truncf %117 : vector<32x192xf32> to vector<32x192xbf16>
    %cst_42 = arith.constant dense<0.000000e+00> : vector<32x128xf32>
    %119 = tpu.matmul %118, %88, %cst_42 {dimension_numbers = #tpu.dot_dimension_numbers<[1], [0], [0], [1], [0, 0, 1, 1], [], []>} : vector<32x192xbf16>, vector<192x128xbf16>, vector<32x128xf32> -> vector<32x128xf32>
    %120 = vector.broadcast %89 : vector<1x128xf32> to vector<32x128xf32>
    %121 = arith.addf %119, %120 : vector<32x128xf32>
    %cst_43 = arith.constant 0.000000e+00 : f32
    %122 = vector.broadcast %cst_43 : f32 to vector<32x128xf32>
    %123 = arith.maximumf %121, %122 : vector<32x128xf32>
    %124 = vector.shape_cast %123 : vector<32x128xf32> to vector<8x4x128xf32>
    %cst_44 = arith.constant dense<0.000000e+00> : vector<8x128xf32>
    %125 = vector.multi_reduction <add>, %124, %cst_44 [1] : vector<8x4x128xf32> to vector<8x128xf32>
    %126 = arith.truncf %125 : vector<8x128xf32> to vector<8x128xbf16>
    %c0_45 = arith.constant 0 : index
    %c0_46 = arith.constant 0 : index
    %127 = vector.load %arg8[%c0_45, %c0_46] : memref<128x128xbf16, #tpu.memory_space<vmem>>, vector<128x128xbf16>
    %cst_47 = arith.constant dense<0.000000e+00> : vector<8x128xf32>
    %128 = tpu.matmul %126, %127, %cst_47 {dimension_numbers = #tpu.dot_dimension_numbers<[1], [0], [0], [1], [0, 0, 1, 1], [], []>} : vector<8x128xbf16>, vector<128x128xbf16>, vector<8x128xf32> -> vector<8x128xf32>
    %c0_48 = arith.constant 0 : index
    %c0_49 = arith.constant 0 : index
    %129 = vector.load %arg9[%c0_48, %c0_49] : memref<1x128xf32, #tpu.memory_space<vmem>>, vector<1x128xf32>
    %130 = vector.broadcast %129 : vector<1x128xf32> to vector<8x128xf32>
    %131 = arith.addf %128, %130 : vector<8x128xf32>
    %132 = arith.mulf %131, %131 : vector<8x128xf32>
    %cst_50 = arith.constant dense<0.000000e+00> : vector<8xf32>
    %133 = vector.multi_reduction <add>, %132, %cst_50 [1] : vector<8x128xf32> to vector<8xf32>
    %134 = vector.shape_cast %133 : vector<8xf32> to vector<8x1xf32>
    %cst_51 = arith.constant 1.000000e-24 : f32
    %135 = vector.broadcast %cst_51 : f32 to vector<8x1xf32>
    %136 = arith.maximumf %134, %135 : vector<8x1xf32>
    %137 = math.rsqrt %136 : vector<8x1xf32>
    %138 = vector.broadcast %137 : vector<8x1xf32> to vector<8x128xf32>
    %139 = arith.mulf %131, %138 : vector<8x128xf32>
    %c0_52 = arith.constant 0 : index
    %c0_53 = arith.constant 0 : index
    %140 = vector.load %arg10[%c0_52, %c0_53] : memref<8x128xf32, #tpu.memory_space<vmem>>, vector<8x128xf32>
    tpu.vector_store %arg10[%c0_52, %c0_53], %139 {strides = array<i32>} : memref<8x128xf32, #tpu.memory_space<vmem>>, vector<8x128xf32>,
    return
  }
  func.func @transform_0(%arg0: i32) -> (i32, i32) {
    %c0_i32 = arith.constant 0 : i32
    %c0_i32_0 = arith.constant 0 : i32
    return %arg0, %c0_i32 : i32, i32
  }
  func.func @transform_1(%arg0: i32) -> (i32, i32) {
    %c0_i32 = arith.constant 0 : i32
    %c0_i32_0 = arith.constant 0 : i32
    %c0_i32_1 = arith.constant 0 : i32
    return %c0_i32, %c0_i32_0 : i32, i32
  }
  func.func @transform_2(%arg0: i32) -> (i32, i32) {
    %c0_i32 = arith.constant 0 : i32
    %c0_i32_0 = arith.constant 0 : i32
    %c0_i32_1 = arith.constant 0 : i32
    return %c0_i32, %c0_i32_0 : i32, i32
  }
  func.func @transform_3(%arg0: i32) -> (i32, i32) {
    %c0_i32 = arith.constant 0 : i32
    %c0_i32_0 = arith.constant 0 : i32
    %c0_i32_1 = arith.constant 0 : i32
    return %c0_i32, %c0_i32_0 : i32, i32
  }
  func.func @transform_4(%arg0: i32) -> (i32, i32) {
    %c0_i32 = arith.constant 0 : i32
    %c0_i32_0 = arith.constant 0 : i32
    %c0_i32_1 = arith.constant 0 : i32
    return %c0_i32, %c0_i32_0 : i32, i32
  }
  func.func @transform_5(%arg0: i32) -> (i32, i32) {
    %c0_i32 = arith.constant 0 : i32
    %c0_i32_0 = arith.constant 0 : i32
    %c0_i32_1 = arith.constant 0 : i32
    return %c0_i32, %c0_i32_0 : i32, i32
  }
  func.func @transform_6(%arg0: i32) -> (i32, i32) {
    %c0_i32 = arith.constant 0 : i32
    %c0_i32_0 = arith.constant 0 : i32
    %c0_i32_1 = arith.constant 0 : i32
    return %c0_i32, %c0_i32_0 : i32, i32
  }
  func.func @transform_7(%arg0: i32) -> (i32, i32) {
    %c0_i32 = arith.constant 0 : i32
    %c0_i32_0 = arith.constant 0 : i32
    %c0_i32_1 = arith.constant 0 : i32
    return %c0_i32, %c0_i32_0 : i32, i32
  }
  func.func @transform_8(%arg0: i32) -> (i32, i32) {
    %c0_i32 = arith.constant 0 : i32
    %c0_i32_0 = arith.constant 0 : i32
    %c0_i32_1 = arith.constant 0 : i32
    return %c0_i32, %c0_i32_0 : i32, i32
  }
  func.func @transform_9(%arg0: i32) -> (i32, i32) {
    %c0_i32 = arith.constant 0 : i32
    %c0_i32_0 = arith.constant 0 : i32
    return %arg0, %c0_i32 : i32, i32
  }
}

</mosaic_0001>

<bundles_post_ra>
// kernel: tpu_custom_call.1
= control target key start
LH: loop header
LB: loop body
LE: loop exit
PB: predicated region body
PF: predicated region fallthrough
CT: control target
= control target key end

     0   :  { %14 = vsyncpa [#allocation3], 0  ;;  %s5084_s0 = inlined_call_operand.vmem [shape: f32[256,1], index: 0, kind: input, shape index: {}]   ;;  %s5085_s1 = inlined_call_operand.vmem [shape: f32[3,32], index: 1, kind: input, shape index: {}]   ;;  %s5086_s2 = inlined_call_operand.vmem [shape: f32[1,32], index: 2, kind: input, shape index: {}]   ;;  %s5087_s3 = inlined_call_operand.vmem [shape: bf16[96,64], index: 3, kind: input, shape index: {}]   ;;  %s5088_s4 = inlined_call_operand.vmem [shape: f32[1,64], index: 4, kind: input, shape index: {}]   ;;  %s5089_s5 = inlined_call_operand.vmem [shape: bf16[192,128], index: 5, kind: input, shape index: {}]   ;;  %s5090_s6 = inlined_call_operand.vmem [shape: f32[1,128], index: 6, kind: input, shape index: {}]   ;;  %s5091_s7 = inlined_call_operand.vmem [shape: bf16[128,128], index: 7, kind: input, shape index: {}]   ;;  %s5092_s8 = inlined_call_operand.vmem [shape: f32[1,128], index: 8, kind: input, shape index: {}]   ;;  %s5093_s9 = inlined_call_operand.hbm [shape: f32[16,128], index: 9, kind: output, shape index: {}]  }
   0x1   :  { %16 = vsyncpa [#allocation3 + $0x1], 0  ;;  %s3749_s30 = smov 0   ;;  %s3751_s10 = smov 0  }
   0x2   :  { %s3753_s11 = smov 0   ;;  %s3755_s12 = smov 0  }
   0x3 LB: > { %s3770_s13 = sadd.s32 4294967295, %s3690_s12   ;;  %s3396_s14 = sadd.s32 4294967294, %s3690_s12   ;;  %s3690_s12 = sphi %s3755_s12, %s5215_s12   ;;  %s3686_s11 = sphi %s3753_s11, %s5214_s11   ;;  %s3682_s10 = sphi %s3751_s10, %s5213_s10   ;;  %s3678_s30 = sphi %s3749_s30, %s5212_s30  }
   0x4   : > { %s3774_s15 = sadd.s32 1, %s3690_s12   ;;  %s223_s16 = sadd.s32 1, %s3686_s11 }
   0x5   : > { %s220_s17 = ssub.s32 %s3690_s12, %s3774_s15  ;;  %p233_p0 = scmp.ne.s32.totalorder %s3686_s11, %s3682_s10 }
   0x6   : > { %p221_p1 = scmp.eq.s32.totalorder %s220_s17, 0  ;;  %p234_p2 = scmp.eq.s32.totalorder %s3770_s13, 1 }
   0x7   : > { %p239_p3 = scmp.ne.s32.totalorder %s3682_s10, %s3678_s30  ;;  %p240_p4 = scmp.eq.s32.totalorder %s3396_s14, 1 }
   0x8   : > { %s3785_s18 = scalar_select %p221_p1, %s3686_s11, %s223_s16  }
   0x9   : > { %p3787_p5 = por %p234_p2, %p233_p0  ;;  %p3791_p6 = por %p240_p4, %p239_p3 }
   0xa   : > { %p3399_p7 = scmp.ge.s32.totalorder %s3690_s12, 1  ;;  %p291_p8 = scmp.lt.s32.totalorder %s3690_s12, 3 }
   0xc   : > { %p292_p9 = pnand %p3399_p7, %p291_p8 }
   0xe   : > { %295 = sbr.rel (%p292_p9) target bundleno = 1502 (0x5de), region = 56 }
  0x15   : > { %s3401_s21 = sshll.u32 %s3770_s13, 4  ;;  %v350_v0 = vlaneseq  ;;  %v5094_v1 = vmov 0   ;;  %s3694_s26 = smov 32  }
  0x16   : > { %3548 = vset.pattern.permute.xlu0 %v5094_v1  ;;  %3547 = vset.pattern.permute.xlu1 %v5094_v1  ;;  %p328_p10 = scmp.lt.s32.totalorder %s3401_s21, 31  ;;  %s3440_s24 = sshll.u32 %s3770_s13, 7 }
  0x17   : > { %v3800_v2 = vshrl.u32 %v350_v0, 7  ;;  %3050 = vmatprep.subr.bf16.mxu1 %v5094_v1  ;;  %s5042_s28 = scalar_lea.hbm %s5093_s9, %s3440_s24  ;;  %s3698_s13 = smov [#allocation2]  }
  0x18   : > { %s5217_s21 = smov (!%p328_p10, %s3401_s21), 31  ;;  %s3632_s16 = sshll.u32 %s3698_s13, 4  ;;  %s3633_s16 = int_to_ptr.vmem [resolvable:$false] %s3632_s16 }
  0x19   : > { %v3804_v3 = vadd.s32 32, %v3800_v2  ;;  %v3807_v4 = vadd.s32 16, %v3800_v2  ;;  %s3402_s22 = sshll.u32 %s5217_s21, 3  ;;  %v371_v5 = vand.u32 15, %v3800_v2  ;;  %v359_v6 = vadd.s32 64, %v3800_v2  ;;  %s3695_s21 = smov 64  }
  0x1a   : > { %s3814_s25 = scalar_lea.vmem %s5084_s0, %s3402_s22  ;;  %v3818_v8 = vadd.s32 48, %v3800_v2  ;;  %vm591_vm0 = vcmp.lt.s32.totalorder %v3800_v2, 1  ;;  %vm656_vm6 = vcmp.lt.s32.totalorder %v3800_v2, 7  ;;  %v360_v23 = vadd.s32 72, %v3800_v2  ;;  %s324_s22 = sand.u32 1, %s3682_s10  }
  0x1b   : > { %5116 = vst [vmem:[#allocation5_spill] sm:$0xff] %v3804_v3  ;;  %5117 = vst [vmem:[#allocation6_spill] sm:$0xff] %v3807_v4  ;;  %v399_v7 = vand.u32 15, %v3804_v3  ;;  %v3821_v9 = vld [vmem:[%s3814_s25 + $0x10] sm:$0xff]  ;;  %v3824_v10 = vld [vmem:[%s3814_s25] sm:$0xff]  ;;  %v385_v12 = vand.u32 15, %v3807_v4 }
  0x1c   : > { %5118 = vst [vmem:[#allocation7_spill] sm:$0xff] %v3818_v8  ;;  %v3827_v11 = vld [vmem:[%s3814_s25 + $0x20] sm:$0xff]  ;;  %802 = vperm.xlu0 %3548, %v3821_v9   ;;  %v577_v13 = vrot.slane %v3821_v9, 7  ;;  %792 = vperm.xlu1 %3547, %v3824_v10   ;;  %v575_v14 = vrot.slane %v3824_v10, 7  ;;  %v3835_v15 = vld [vmem:[%s3814_s25 + $0x78] sm:$0xff]  ;;  %vm3842_vm1 = vcmp.eq.s32.totalorder %v371_v5, 0 }
  0x1d   : > { %v3839_v16 = vld [vmem:[%s3814_s25 + $0x18] sm:$0xff]  ;;  %v579_v17 = vrot.slane %v3827_v11, 7  ;;  %v590_v19 = vrot.slane %v3835_v15, 7  ;;  %v3848_v20 = vld [vmem:[%s3814_s25 + $0x8] sm:$0xff]  ;;  %v427_v22 = vand.u32 15, %v359_v6  ;;  %vm3853_vm2 = vcmp.eq.s32.totalorder %v399_v7, 0 }
  0x1e   : > { %v3851_v21 = vld [vmem:[%s3814_s25 + $0x38] sm:$0xff]  ;;  %v578_v24 = vrot.slane %v3839_v16, 7  ;;  %v576_v25 = vrot.slane %v3848_v20, 7  ;;  %v3860_v26 = vld [vmem:[%s3814_s25 + $0x40] sm:$0xff]  ;;  %v3863_v27 = vld [vmem:[%s3814_s25 + $0x28] sm:$0xff]  ;;  %v413_v28 = vand.u32 15, %v3818_v8 }
  0x1f   : > { %v607_v29 = vsel %vm591_vm0, %v590_v19, %v575_v14  ;;  %vm3870_vm3 = vcmp.eq.s32.totalorder %v385_v12, 0  ;;  %v582_v31 = vrot.slane %v3851_v21, 7  ;;  %v583_v32 = vrot.slane %v3860_v26, 7  ;;  %v3877_v33 = vld [vmem:[%s3814_s25 + $0x30] sm:$0xff]  ;;  %v3920_v55 = vld [vmem:[%s3814_s25 + $0x48] sm:$0xff]  ;;  %s3400_s23 = sshll.u32 %s324_s22, 3 }
  0x20   : > { %812 = vperm.xlu1 %3547, %v3827_v11   ;;  %v608_v34 = vsel %vm3842_vm1, 0.0, %v607_v29  ;;  %v603_v35 = vsel %vm591_vm0, %v578_v24, %v579_v17  ;;  %v605_v36 = vsel %vm591_vm0, %v576_v25, %v577_v13  ;;  %vm567_vm4 = vcmp.eq.s32.totalorder %v427_v22, 0  ;;  %v3927_v57 = vld [vmem:[%s3814_s25 + $0x70] sm:$0xff]  ;;  %s3324_s29 = scalar_lea.sflag [#allocation3], %s324_s22  ;;  %s3634_s17 = scalar_lea.vmem %s3633_s16, 256 }
  0x21   : > { %692 = vperm.xlu0 %3548, %v608_v34   ;;  %v612_v37 = vsel %vm3853_vm2, 0.0, %v603_v35  ;;  %v580_v38 = vrot.slane %v3863_v27, 7  ;;  %v610_v39 = vsel %vm3870_vm3, 0.0, %v605_v36  ;;  %v599_v40 = vsel %vm591_vm0, %v582_v31, %v583_v32  ;;  %v3983_v22 = vld [vmem:[%s3814_s25 + $0x50] sm:$0xff]  ;;  %v4009_v35 = vld [vmem:[%s3814_s25 + $0x58] sm:$0xff]  ;;  %v346_v36 = vld [vmem:[%s3814_s25 + $0x60] sm:$0xff] }
  0x22   : > { %vm565_vm5 = vcmp.eq.s32.totalorder %v413_v28, 0  ;;  %v581_v41 = vrot.slane %v3877_v33, 7  ;;  %v616_v43 = vsel %vm567_vm4, 0.0, %v599_v40  ;;  %v642_v45 = vrot.slane %v3821_v9, 1 }
  0x23   : > { %v643_v46 = vrot.slane %v3839_v16, 1  ;;  %v640_v47 = vrot.slane %v3824_v10, 1  ;;  %v641_v48 = vrot.slane %v3848_v20, 1  ;;  %v646_v50 = vrot.slane %v3877_v33, 1 }
  0x24   : > { %712 = vperm.xlu1 %3547, %v612_v37   ;;  %v601_v42 = vsel %vm591_vm0, %v580_v38, %v581_v41  ;;  %v647_v51 = vrot.slane %v3851_v21, 1  ;;  %v644_v52 = vrot.slane %v3827_v11, 1  ;;  %v645_v54 = vrot.slane %v3863_v27, 1 }
  0x25   : > { %702 = vperm.xlu0 %3548, %v610_v39   ;;  %v614_v44 = vsel %vm565_vm5, 0.0, %v601_v42  ;;  %v669_v49 = vsel %vm656_vm6, %v642_v45, %v643_v46  ;;  %v671_v53 = vsel %vm656_vm6, %v640_v47, %v641_v48  ;;  %v648_v59 = vrot.slane %v3860_v26, 1 }
  0x26   : > { %v665_v56 = vsel %vm656_vm6, %v646_v50, %v647_v51  ;;  %v667_v58 = vsel %vm656_vm6, %v644_v52, %v645_v54  ;;  %v649_v60 = vrot.slane %v3920_v55, 1  ;;  %v589_v61 = vrot.slane %v3927_v57, 7 }
  0x27   : > { %v606_v62 = vsel %vm591_vm0, %v575_v14, %v576_v25  ;;  %v602_v5 = vsel %vm591_vm0, %v579_v17, %v580_v38  ;;  %v604_v6 = vsel %vm591_vm0, %v577_v13, %v578_v24  ;;  %v3955_v7 = vadd.s32 8, %v3800_v2 }
  0x28   : > { %732 = vperm.xlu1 %3547, %v616_v43   ;;  %v663_v63 = vsel %vm656_vm6, %v648_v59, %v649_v60  ;;  %v3944_v0 = vsel %vm591_vm0, %v589_v61, %v590_v19  ;;  %v600_v11 = vsel %vm591_vm0, %v581_v41, %v582_v31  ;;  %v584_v12 = vrot.slane %v3920_v55, 7 }
  0x29   : > { %722 = vperm.xlu0 %3548, %v614_v44   ;;  %5125 = vst [vmem:[#allocation8_spill] sm:$0xff] %v3955_v7  ;;  %v378_v9 = vand.u32 15, %v3955_v7  ;;  %v3964_v14 = vadd.s32 24, %v3800_v2  ;;  %v3967_v13 = vadd.s32 40, %v3800_v2  ;;  %v670_v17 = vsel %vm656_vm6, %v641_v48, %v642_v45 }
  0x2a   : > { %v3987_v24 = vadd.s32 56, %v3800_v2  ;;  %v650_v28 = vrot.slane %v3983_v22, 1  ;;  %v434_v31 = vand.u32 15, %v360_v23  ;;  %v361_v34 = vadd.s32 80, %v3800_v2 }
  0x2b   : > { %5126 = vst [vmem:[#allocation9_spill] sm:$0xff] %v3964_v14  ;;  %5127 = vst [vmem:[#allocation10_spill] sm:$0xff] %v3967_v13  ;;  %vm3976_vm7 = vcmp.eq.s32.totalorder %v378_v9, 15  ;;  %v392_v19 = vand.u32 15, %v3964_v14  ;;  %v586_v42 = vrot.slane %v4009_v35, 7  ;;  %v587_v43 = vrot.slane %v346_v36, 7 }
  0x2c   : > { %832 = vperm.xlu1 %3547, %v3860_v26   ;;  %5130 = vst [vmem:[#allocation11_spill] sm:$0xff] %v3987_v24  ;;  %v674_v25 = vsel %vm3976_vm7, 0.0, %v670_v17  ;;  %v668_v26 = vsel %vm656_vm6, %v643_v46, %v644_v52  ;;  %v662_v39 = vsel %vm656_vm6, %v649_v60, %v650_v28  ;;  %vm4019_vm10 = vcmp.eq.s32.totalorder %v434_v31, 15 }
  0x2d   : > { %822 = vperm.xlu0 %3548, %v3877_v33   ;;  %vm3997_vm8 = vcmp.eq.s32.totalorder %v392_v19, 15  ;;  %v420_v33 = vand.u32 15, %v3987_v24  ;;  %v664_v44 = vsel %vm656_vm6, %v647_v51, %v648_v59  ;;  %v441_v45 = vand.u32 15, %v361_v34  ;;  %v347_v51 = vld [vmem:[%s3814_s25 + $0x68] sm:$0xff]  ;;  %s326_s25 = scalar_lea.vmem [#allocation2], %s3400_s23 }
  0x2e   : > { %v676_v37 = vsel %vm3997_vm8, 0.0, %v668_v26  ;;  %v585_v46 = vrot.slane %v3983_v22, 7  ;;  %v682_v48 = vsel %vm4019_vm10, 0.0, %v662_v39  ;;  %v365_v52 = vadd.s32 112, %v3800_v2 }
  0x2f   : > { %vm631_vm11 = vcmp.eq.s32.totalorder %v420_v33, 15  ;;  %vm569_vm13 = vcmp.eq.s32.totalorder %v441_v45, 0  ;;  %v652_v59 = vrot.slane %v346_v36, 1  ;;  %v653_v60 = vrot.slane %v347_v51, 1 }
  0x30   : > { %918 = vperm.xlu1 %3547, %v669_v49   ;;  %v680_v49 = vsel %vm631_vm11, 0.0, %v664_v44  ;;  %v364_v19 = vadd.s32 104, %v3800_v2  ;;  %v772_v34 = vsub.s32 0, %v3800_v2  ;;  %vm1413_vm3 = vcmask 254976  }
  0x31   : > { %908 = vperm.xlu0 %3548, %v671_v53   ;;  %vm2043_vm4 = vcmask 1041409   ;;  %vm2045_vm5 = vcmask 1042434   ;;  %vm2047_vm7 = vcmask 1043459   ;;  %vm2049_vm8 = vcmask 1044484  }
  0x32   : > { %v462_v23 = vand.u32 15, %v364_v19  ;;  %vm2053_vm10 = vcmask 1046534   ;;  %vm2055_vm11 = vcmask 1047559  }
  0x34   : > { %938 = vperm.xlu1 %3547, %v665_v56   ;;  %v588_v56 = vrot.slane %v347_v51, 7  ;;  %vm637_vm2 = vcmp.eq.s32.totalorder %v462_v23, 15 }
  0x35   : > { %928 = vperm.xlu0 %3548, %v667_v58  }
  0x36   : > { %v593_v58 = vsel %vm591_vm0, %v588_v56, %v589_v61  ;;  %v655_v61 = vrot.slane %v3835_v15, 1  ;;  %v594_v17 = vsel %vm591_vm0, %v587_v43, %v588_v56  ;;  %v4091_v56 = vld [vmem:[%s5086_s2] ss:$0 sm:$0xff] }
  0x38   : > { %697 = vperm.xlu1 %3547, %v606_v62   ;;  %v672_v26 = vsel %vm656_vm6, %v655_v61, %v640_v47  ;;  %v872_v47 = vsub.s32 1, %v3800_v2 }
  0x39   : > { %948 = vperm.xlu0 %3548, %v663_v63   ;;  %v651_v63 = vrot.slane %v4009_v35, 1 }
  0x3c   : > { %717 = vperm.xlu1 %3547, %v602_v5   ;;  %v659_v5 = vsel %vm656_vm6, %v652_v59, %v653_v60 }
  0x3d   : > { %707 = vperm.xlu0 %3548, %v604_v6   ;;  %v661_v6 = vsel %vm656_vm6, %v650_v28, %v651_v63 }
  0x40   : > { %807 = vperm.xlu1 %3547, %v3839_v16   ;;  %v598_v16 = vsel %vm591_vm0, %v583_v32, %v584_v12  ;;  %v363_v32 = vadd.s32 96, %v3800_v2 }
  0x41   : > { %797 = vperm.xlu0 %3548, %v3848_v20   ;;  %v406_v20 = vand.u32 15, %v3967_v13 }
  0x42   : > { %v455_v41 = vand.u32 15, %v363_v32 }
  0x43   : > { %vm4001_vm9 = vcmp.eq.s32.totalorder %v406_v20, 15  ;;  %v660_v20 = vsel %vm656_vm6, %v651_v63, %v652_v59 }
  0x44   : > { %727 = vperm.xlu1 %3547, %v600_v11   ;;  %vm571_vm12 = vcmp.eq.s32.totalorder %v455_v41, 0  ;;  %v654_v11 = vrot.slane %v3927_v57, 1  ;;  %v3693_v41 = vmov 1983009808  }
  0x45   : > { %817 = vperm.xlu0 %3548, %v3863_v27   ;;  %v666_v27 = vsel %vm656_vm6, %v645_v54, %v646_v50  ;;  %v595_v50 = vsel %vm591_vm0, %v586_v42, %v587_v43 }
  0x46   : > { %v678_v38 = vsel %vm4001_vm9, 0.0, %v666_v27  ;;  %v620_v53 = vsel %vm571_vm12, 0.0, %v595_v50  ;;  %v657_v9 = vsel %vm656_vm6, %v654_v11, %v655_v61  ;;  %v658_v27 = vsel %vm656_vm6, %v653_v60, %v654_v11 }
  0x47   : > { %v686_v29 = vsel %vm637_vm2, 0.0, %v658_v27  ;;  %vm2051_vm9 = vcmask 1045509  }
  0x48   : > { %827 = vperm.xlu1 %3547, %v3851_v21   ;;  %v597_v21 = vsel %vm591_vm0, %v584_v12, %v585_v46  ;;  %v596_v12 = vsel %vm591_vm0, %v585_v46, %v586_v42  ;;  %v1079_v42 = vunpack.c.l.s4 %v3693_v41 }
  0x49   : > { %737 = vperm.xlu0 %3548, %v598_v16   ;;  %v618_v54 = vsel %vm569_vm13, 0.0, %v597_v21  ;;  %v362_v16 = vadd.s32 88, %v3800_v2 }
  0x4a   : > { %v1080_v50 = vunpack.c.0.s8 %v1079_v42 }
  0x4b   : > { %v448_v18 = vand.u32 15, %v362_v16 }
  0x4c   : > { %913 = vperm.xlu1 %3547, %v674_v25  }
  0x4d   : > { %837 = vperm.xlu0 %3548, %v3920_v55   ;;  %v469_v55 = vand.u32 15, %v365_v52  ;;  %vm635_vm15 = vcmp.eq.s32.totalorder %v448_v18, 15 }
  0x4e   : > { %v684_v25 = vsel %vm635_vm15, 0.0, %v660_v20 }
  0x4f   : > { %vm573_vm14 = vcmp.eq.s32.totalorder %v469_v55, 0 }
  0x50   : > { %933 = vperm.xlu1 %3547, %v678_v38   ;;  %v622_v62 = vsel %vm573_vm14, 0.0, %v593_v58 }
  0x51   : > { %923 = vperm.xlu0 %3548, %v676_v37   ;;  %v988_v37 = vsub.s32 2, %v3800_v2 }
  0x54   : > { %953 = vperm.xlu1 %3547, %v682_v48  }
  0x55   : > { %943 = vperm.xlu0 %3548, %v680_v49  }
  0x58   : > { %752 = vperm.xlu1 %3547, %v620_v53  }
  0x59   : > { %742 = vperm.xlu0 %3548, %v618_v54  }
  0x5c   : > { %852 = vperm.xlu1 %3547, %v346_v36  }
  0x5d   : > { %842 = vperm.xlu0 %3548, %v3983_v22  }
  0x60   : > { %862 = vperm.xlu1 %3547, %v3927_v57   ;;  %v366_v57 = vadd.s32 120, %v3800_v2 }
  0x61   : > { %762 = vperm.xlu0 %3548, %v622_v62  }
  0x62   : > { %v476_v22 = vand.u32 15, %v366_v57 }
  0x64   : > { %968 = vperm.xlu1 %3547, %v659_v5   ;;  %vm639_vm1 = vcmp.eq.s32.totalorder %v476_v22, 15  ;;  %v4098_v5 = vsub.s32 %v1080_v50, %v3800_v2 }
  0x65   : > { %958 = vperm.xlu0 %3548, %v661_v6   ;;  %v688_v28 = vsel %vm639_vm1, 0.0, %v672_v26 }
  0x68   : > { %747 = vperm.xlu1 %3547, %v596_v12  }
  0x69   : > { %978 = vperm.xlu0 %3548, %v657_v9  }
  0x6c   : > { %847 = vperm.xlu1 %3547, %v4009_v35   ;;  %v689_v35 = vld [vmem:[%s5085_s1] sm:$0x7] }
  0x6d   : > { %757 = vperm.xlu0 %3548, %v594_v17   ;;  %v4076_v38 = vrot.slane %v689_v35, %v772_v34  ;;  %v4078_v39 = vrot.slane %v689_v35, %v872_v47  ;;  %v4081_v45 = vrot.slane %v689_v35, %v988_v37 }
  0x6f   : > { %5137 = vst [vmem:[#allocation12_spill] sm:$0xff] %v4081_v45 }
  0x70   : > { %767 = vperm.xlu1 %3547, %v3944_v0  }
  0x71   : > { %857 = vperm.xlu0 %3548, %v347_v51  }
  0x74   : > { %963 = vperm.xlu1 %3547, %v684_v25  }
  0x75   : > { %867 = vperm.xlu0 %3548, %v3835_v15  }
  0x78   : > { %983 = vperm.xlu1 %3547, %v688_v28  }
  0x79   : > { %973 = vperm.xlu0 %3548, %v686_v29  }
  0x9b   : > { %v803_v0 = vpop.permute.xlu0 %802  ;;  %v793_v30 = vpop.permute.xlu1 %792 }
  0x9c   : > { %v876_v48 = vmul.f32 %v4078_v39, %v803_v0  ;;  %v874_v49 = vmul.f32 %v4078_v39, %v793_v30 }
  0x9f   : > { %v813_v31 = vpop.permute.xlu1 %812 }
  0xa0   : > { %v693_v32 = vpop.permute.xlu0 %692  ;;  %v878_v57 = vmul.f32 %v4078_v39, %v813_v31 }
  0xa1   : > { %v774_v46 = vmul.f32 %v4076_v38, %v693_v32 }
  0xa3   : > { %v713_v33 = vpop.permute.xlu1 %712  ;;  %v890_v55 = vadd.f32 %v874_v49, %v774_v46 }
  0xa4   : > { %v703_v10 = vpop.permute.xlu0 %702  ;;  %v778_v63 = vmul.f32 %v4076_v38, %v713_v33 }
  0xa5   : > { %v776_v43 = vmul.f32 %v4076_v38, %v703_v10 }
  0xa6   : > { %v894_v28 = vadd.f32 %v878_v57, %v778_v63 }
  0xa7   : > { %v733_v36 = vpop.permute.xlu1 %732  ;;  %v892_v52 = vadd.f32 %v876_v48, %v776_v43 }
  0xa8   : > { %v723_v15 = vpop.permute.xlu0 %722  ;;  %v782_v23 = vmul.f32 %v4076_v38, %v733_v36 }
  0xa9   : > { %v780_v59 = vmul.f32 %v4076_v38, %v723_v15 }
  0xab   : > { %v833_v40 = vpop.permute.xlu1 %832 }
  0xac   : > { %v823_v44 = vpop.permute.xlu0 %822  ;;  %v882_v61 = vmul.f32 %v4078_v39, %v833_v40 }
  0xad   : > { %v880_v51 = vmul.f32 %v4078_v39, %v823_v44 }
  0xae   : > { %v4110_v30 = vadd.f32 %v882_v61, %v782_v23 }
  0xaf   : > { %v919_v21 = vpop.permute.xlu1 %918  ;;  %v896_v12 = vadd.f32 %v880_v51, %v780_v59 }
  0xb0   : > { %v992_v53 = vmul.f32 %v4081_v45, %v919_v21  ;;  %v909_v54 = vpop.permute.xlu0 %908 }
  0xb1   : > { %v990_v58 = vmul.f32 %v4081_v45, %v909_v54 }
  0xb2   : > { %v1008_v60 = vadd.f32 %v992_v53, %v892_v52 }
  0xb3   : > { %v1006_v6 = vadd.f32 %v990_v58, %v890_v55  ;;  %v939_v11 = vpop.permute.xlu1 %938 }
  0xb4   : > { %v1031_v9 = vadd.f32 %v4091_v56, %v1008_v60  ;;  %v996_v16 = vmul.f32 %v4081_v45, %v939_v11  ;;  %v929_v17 = vpop.permute.xlu0 %928 }
  0xb5   : > { %v1029_v19 = vadd.f32 %v4091_v56, %v1006_v6  ;;  %v994_v20 = vmul.f32 %v4081_v45, %v929_v17 }
  0xb6   : > { %v1047_v25 = vmax.f32 %v1031_v9, 0.0  ;;  %v1012_v26 = vadd.f32 %v996_v16, %v896_v12 }
  0xb7   : > { %v1045_v29 = vmax.f32 %v1029_v19, 0.0  ;;  %v698_v0 = vpop.permute.xlu1 %697  ;;  %v1010_v47 = vadd.f32 %v994_v20, %v894_v28 }
  0xb8   : > { %v1111_v32 = vcombine.high %v1047_v25, %v1047_v25  ;;  %v1118_v31 = vrot.slane %v1047_v25, %v4098_v5  ;;  %v1035_v33 = vadd.f32 %v4091_v56, %v1012_v26  ;;  %v949_v35 = vpop.permute.xlu0 %948  ;;  %v4116_v36 = vmul.f32 %v4076_v38, %v698_v0 }
  0xb9   : > { %v1077_v10 = vcombine.high %v1045_v29, %v1045_v29  ;;  %v1084_v34 = vrot.slane %v1045_v29, %v4098_v5 }
  0xba   : > { %v1125_v15 = vrot.slane %v1111_v32, %v4098_v5  ;;  %v1126_v37 = vcombine.high %v1118_v31, %v1118_v31  ;;  %v1470_v40 = vsel %vm1413_vm3, %v1118_v31, -inf  ;;  %v4120_v41 = vmax.f32 %v1035_v33, 0.0 }
  0xbb   : > { %v1471_v42 = vrot.slane %v1470_v40, 4  ;;  %v1091_v43 = vrot.slane %v1077_v10, %v4098_v5  ;;  %v1092_v44 = vcombine.high %v1084_v34, %v1084_v34  ;;  %v1414_v46 = vsel %vm1413_vm3, %v1084_v34, -inf }
  0xbc   : > { %v1127_v48 = vcombine.high %v1125_v15, %v1125_v15  ;;  %v1477_v49 = vsel %vm1413_vm3, %v1126_v37, -inf  ;;  %v1484_v50 = vsel %vm1413_vm3, %v1125_v15, -inf  ;;  %v1415_v21 = vrot.slane %v1414_v46, 4  ;;  %v4129_v12 = vpop.permute.xlu0 %707 }
  0xbd   : > { %v1472_v52 = vmax.f32 %v1470_v40, %v1471_v42  ;;  %v1478_v51 = vrot.slane %v1477_v49, 4  ;;  %v1485_v53 = vrot.slane %v1484_v50, 4  ;;  %v1093_v54 = vcombine.high %v1091_v43, %v1091_v43 }
  0xbe   : > { %v1491_v55 = vsel %vm1413_vm3, %v1127_v48, -inf  ;;  %v1416_v58 = vmax.f32 %v1414_v46, %v1415_v21  ;;  %v1421_v59 = vsel %vm1413_vm3, %v1092_v44, -inf  ;;  %v1428_v60 = vsel %vm1413_vm3, %v1091_v43, -inf  ;;  %v4133_v48 = vpop.permute.xlu1 %717 }
  0xbf   : > { %v1473_v63 = vrot.slane %v1472_v52, 2  ;;  %v1479_v6 = vmax.f32 %v1477_v49, %v1478_v51  ;;  %v1486_v11 = vmax.f32 %v1484_v50, %v1485_v53  ;;  %v1492_v61 = vrot.slane %v1491_v55, 4 }
  0xc0   : > { %v1417_v9 = vrot.slane %v1416_v58, 2  ;;  %v1422_v16 = vrot.slane %v1421_v59, 4  ;;  %v1429_v17 = vrot.slane %v1428_v60, 4  ;;  %v1435_v57 = vsel %vm1413_vm3, %v1093_v54, -inf  ;;  %v4135_v49 = vpop.permute.xlu0 %797 }
  0xc1   : > { %v1474_v19 = vmax.f32 %v1472_v52, %v1473_v63  ;;  %v1480_v20 = vrot.slane %v1479_v6, 2  ;;  %v1487_v23 = vrot.slane %v1486_v11, 2  ;;  %v1493_v25 = vmax.f32 %v1491_v55, %v1492_v61 }
  0xc2   : > { %v1418_v26 = vmax.f32 %v1416_v58, %v1417_v9  ;;  %v1423_v28 = vmax.f32 %v1421_v59, %v1422_v16  ;;  %v1430_v29 = vmax.f32 %v1428_v60, %v1429_v17  ;;  %v1436_v0 = vrot.slane %v1435_v57, 4 }
  0xc3   : > { %v1475_v32 = vrot.slane %v1474_v19, 1  ;;  %v1481_v31 = vmax.f32 %v1479_v6, %v1480_v20  ;;  %v1488_v33 = vmax.f32 %v1486_v11, %v1487_v23  ;;  %v1494_v10 = vrot.slane %v1493_v25, 2 }
  0xc4   : > { %v1424_v34 = vrot.slane %v1423_v28, 2  ;;  %v1431_v15 = vrot.slane %v1430_v29, 2  ;;  %v1437_v37 = vmax.f32 %v1435_v57, %v1436_v0  ;;  %v1033_v40 = vadd.f32 %v4091_v56, %v1010_v47 }
  0xc5   : > { %v1482_v42 = vrot.slane %v1481_v31, 1  ;;  %v1489_v43 = vrot.slane %v1488_v33, 1  ;;  %v1495_v44 = vmax.f32 %v1493_v25, %v1494_v10  ;;  %v1419_v46 = vrot.slane %v1418_v26, 1 }
  0xc6   : > { %v1425_v50 = vmax.f32 %v1423_v28, %v1424_v34  ;;  %v1432_v21 = vmax.f32 %v1430_v29, %v1431_v15  ;;  %v1438_v52 = vrot.slane %v1437_v37, 2  ;;  %v998_v51 = vmul.f32 %v4081_v45, %v949_v35  ;;  %v4154_v28 = vpop.permute.xlu0 %817 }
  0xc7   : > { %v1476_v53 = vmax.f32 %v1474_v19, %v1475_v32  ;;  %v1483_v54 = vmax.f32 %v1481_v31, %v1482_v42  ;;  %v1496_v55 = vrot.slane %v1495_v44, 1  ;;  %v1179_v58 = vcombine.high %v4120_v41, %v4120_v41 }
  0xc8   : > { %v1426_v47 = vrot.slane %v1425_v50, 1  ;;  %v1433_v59 = vrot.slane %v1432_v21, 1  ;;  %v1439_v60 = vmax.f32 %v1437_v37, %v1438_v52  ;;  %v1186_v63 = vrot.slane %v4120_v41, %v4098_v5  ;;  %v4152_v41 = vpop.permute.xlu1 %807 }
  0xc9   : > { %v4142_v6 = vmax.f32 %v1488_v33, %v1489_v43  ;;  %v1420_v11 = vmax.f32 %v1418_v26, %v1419_v46  ;;  %v1193_v61 = vrot.slane %v1179_v58, %v4098_v5  ;;  %v1049_v9 = vmax.f32 %v1033_v40, 0.0 }
  0xca   : > { %v4145_v16 = vmax.f32 %v1495_v44, %v1496_v55  ;;  %v4148_v35 = vsel %vm2043_vm4, %v1483_v54, %v1476_v53  ;;  %v1427_v17 = vmax.f32 %v1425_v50, %v1426_v47  ;;  %v1194_v57 = vcombine.high %v1186_v63, %v1186_v63 }
  0xcb   : > { %v1195_v19 = vcombine.high %v1193_v61, %v1193_v61  ;;  %v1582_v20 = vsel %vm1413_vm3, %v1186_v63, -inf  ;;  %v1596_v23 = vsel %vm1413_vm3, %v1193_v61, -inf  ;;  %v1145_v25 = vcombine.high %v1049_v9, %v1049_v9  ;;  %v4168_v61 = vpop.permute.xlu0 %737 }
  0xcc   : > { %v4156_v26 = vmax.f32 %v1432_v21, %v1433_v59  ;;  %v1440_v29 = vrot.slane %v1439_v60, 1  ;;  %v1583_v0 = vrot.slane %v1582_v20, 4  ;;  %v1589_v32 = vsel %vm1413_vm3, %v1194_v57, -inf  ;;  %v4166_v63 = vpop.permute.xlu1 %727 }
  0xcd   : > { %v1590_v31 = vrot.slane %v1589_v32, 4  ;;  %v1597_v33 = vrot.slane %v1596_v23, 4  ;;  %v1603_v10 = vsel %vm1413_vm3, %v1195_v19, -inf  ;;  %v1152_v34 = vrot.slane %v1049_v9, %v4098_v5 }
  0xce   : > { %v1584_v15 = vmax.f32 %v1582_v20, %v1583_v0  ;;  %v1604_v37 = vrot.slane %v1603_v10, 4  ;;  %v1159_v40 = vrot.slane %v1145_v25, %v4098_v5  ;;  %v1014_v42 = vadd.f32 %v998_v51, %v4110_v30 }
  0xcf   : > { %v1591_v43 = vmax.f32 %v1589_v32, %v1590_v31  ;;  %v1598_v44 = vmax.f32 %v1596_v23, %v1597_v33  ;;  %v1160_v46 = vcombine.high %v1152_v34, %v1152_v34  ;;  %v1526_v50 = vsel %vm1413_vm3, %v1152_v34, -inf }
  0xd0   : > { %v1585_v21 = vrot.slane %v1584_v15, 2  ;;  %v1605_v52 = vmax.f32 %v1603_v10, %v1604_v37  ;;  %v1161_v53 = vcombine.high %v1159_v40, %v1159_v40  ;;  %v1527_v54 = vrot.slane %v1526_v50, 4 }
  0xd1   : > { %v1592_v55 = vrot.slane %v1591_v43, 2  ;;  %v1599_v58 = vrot.slane %v1598_v44, 2  ;;  %v1533_v47 = vsel %vm1413_vm3, %v1160_v46, -inf  ;;  %v1540_v59 = vsel %vm1413_vm3, %v1159_v40, -inf }
  0xd2   : > { %v1586_v30 = vmax.f32 %v1584_v15, %v1585_v21  ;;  %v1606_v51 = vrot.slane %v1605_v52, 2  ;;  %v1528_v9 = vmax.f32 %v1526_v50, %v1527_v54  ;;  %v1534_v57 = vrot.slane %v1533_v47, 4 }
  0xd3   : > { %v1593_v19 = vmax.f32 %v1591_v43, %v1592_v55  ;;  %v1600_v20 = vmax.f32 %v1598_v44, %v1599_v58  ;;  %v1541_v23 = vrot.slane %v1540_v59, 4  ;;  %v1547_v25 = vsel %vm1413_vm3, %v1161_v53, -inf  ;;  %v828_v53 = vpop.permute.xlu1 %827  ;;  %v838_v55 = vpop.permute.xlu0 %837 }
  0xd4   : > { %v1587_v0 = vrot.slane %v1586_v30, 1  ;;  %v1607_v32 = vmax.f32 %v1605_v52, %v1606_v51  ;;  %v1529_v31 = vrot.slane %v1528_v9, 2  ;;  %v1535_v33 = vmax.f32 %v1533_v47, %v1534_v57 }
  0xd5   : > { %v1594_v10 = vrot.slane %v1593_v19, 1  ;;  %v1601_v34 = vrot.slane %v1600_v20, 1  ;;  %v1542_v37 = vmax.f32 %v1540_v59, %v1541_v23  ;;  %v1548_v40 = vrot.slane %v1547_v25, 4 }
  0xd6   : > { %v4171_v46 = vmax.f32 %v1439_v60, %v1440_v29  ;;  %v1608_v1 = vrot.slane %v1607_v32, 1  ;;  %v1530_v15 = vmax.f32 %v1528_v9, %v1529_v31  ;;  %v1536_v21 = vrot.slane %v1535_v33, 2 }
  0xd7   : > { %v4174_v50 = vsel %vm2043_vm4, %v1427_v17, %v1420_v11  ;;  %v1595_v43 = vmax.f32 %v1593_v19, %v1594_v10  ;;  %v1543_v44 = vrot.slane %v1542_v37, 2  ;;  %v1549_v54 = vmax.f32 %v1547_v25, %v1548_v40 }
  0xd8   : > { %v1588_v52 = vmax.f32 %v1586_v30, %v1587_v0  ;;  %v4176_v58 = vmax.f32 %v1600_v20, %v1601_v34  ;;  %v1537_v47 = vmax.f32 %v1535_v33, %v1536_v21  ;;  %v1037_v59 = vadd.f32 %v4091_v56, %v1014_v42  ;;  %v914_v34 = vpop.permute.xlu1 %913 }
  0xd9   : > { %v4179_v51 = vmax.f32 %v1607_v32, %v1608_v1  ;;  %v1531_v60 = vrot.slane %v1530_v15, 1  ;;  %v1544_v29 = vmax.f32 %v1542_v37, %v1543_v44  ;;  %v1550_v9 = vrot.slane %v1549_v54, 2  ;;  %v924_v37 = vpop.permute.xlu0 %923 }
  0xda   : > { %v4182_v57 = vsel %vm2043_vm4, %v1595_v43, %v1588_v52  ;;  %v1538_v11 = vrot.slane %v1537_v47, 1  ;;  %v1053_v17 = vmax.f32 %v1037_v59, 0.0  ;;  %v777_v19 = vmul.f32 %v4076_v38, %v4129_v12 }
  0xdb   : > { %5138 = vst [vmem:[#allocation13_spill] sm:$0xff] %v4179_v51  ;;  %v1545_v23 = vrot.slane %v1544_v29, 1  ;;  %v1551_v30 = vmax.f32 %v1549_v54, %v1550_v9  ;;  %v875_v20 = vmul.f32 %v4078_v39, %v4135_v49  ;;  %v877_v1 = vmul.f32 %v4078_v39, %v4152_v41 }
  0xdc   : > { %v1539_v42 = vmax.f32 %v1537_v47, %v1538_v11  ;;  %v1213_v25 = vcombine.high %v1053_v17, %v1053_v17  ;;  %v1220_v0 = vrot.slane %v1053_v17, %v4098_v5  ;;  %v879_v32 = vmul.f32 %v4078_v39, %v4154_v28 }
  0xdd   : > { %v1532_v31 = vmax.f32 %v1530_v15, %v1531_v60  ;;  %v4193_v33 = vmax.f32 %v1544_v29, %v1545_v23  ;;  %v1552_v10 = vrot.slane %v1551_v30, 1  ;;  %v779_v12 = vmul.f32 %v4076_v38, %v4133_v48 }
  0xde   : > { %v1227_v49 = vrot.slane %v1213_v25, %v4098_v5  ;;  %v1228_v40 = vcombine.high %v1220_v0, %v1220_v0  ;;  %v1638_v41 = vsel %vm1413_vm3, %v1220_v0, -inf  ;;  %v891_v21 = vadd.f32 %v875_v20, %v4116_v36  ;;  %v944_v25 = vpop.permute.xlu0 %943 }
  0xdf   : > { %v4200_v43 = vmax.f32 %v1551_v30, %v1552_v10  ;;  %v4203_v28 = vsel %vm2043_vm4, %v1539_v42, %v1532_v31  ;;  %v1639_v15 = vrot.slane %v1638_v41, 4  ;;  %v893_v44 = vadd.f32 %v877_v1, %v777_v19  ;;  %v934_v42 = vpop.permute.xlu1 %933 }
  0xe0   : > { %v1229_v54 = vcombine.high %v1227_v49, %v1227_v49  ;;  %v1645_v52 = vsel %vm1413_vm3, %v1228_v40, -inf  ;;  %v1652_v48 = vsel %vm1413_vm3, %v1227_v49, -inf  ;;  %v895_v47 = vadd.f32 %v879_v32, %v779_v12 }
  0xe1   : > { %v1640_v59 = vmax.f32 %v1638_v41, %v1639_v15  ;;  %v1646_v60 = vrot.slane %v1645_v52, 4  ;;  %v1653_v29 = vrot.slane %v1652_v48, 4  ;;  %v781_v9 = vmul.f32 %v4076_v38, %v4166_v63 }
  0xe2   : > { %v1659_v36 = vsel %vm1413_vm3, %v1229_v54, -inf  ;;  %v783_v11 = vmul.f32 %v4076_v38, %v4168_v61  ;;  %v991_v17 = vmul.f32 %v4081_v45, %v914_v34  ;;  %v993_v19 = vmul.f32 %v4081_v45, %v924_v37 }
  0xe3   : > { %v1641_v23 = vrot.slane %v1640_v59, 2  ;;  %v1647_v30 = vmax.f32 %v1645_v52, %v1646_v60  ;;  %v1654_v20 = vmax.f32 %v1652_v48, %v1653_v29  ;;  %v1660_v1 = vrot.slane %v1659_v36, 4 }
  0xe4   : > { %v881_v0 = vmul.f32 %v4078_v39, %v828_v53  ;;  %v883_v32 = vmul.f32 %v4078_v39, %v838_v55  ;;  %v1007_v63 = vadd.f32 %v991_v17, %v891_v21  ;;  %v1009_v31 = vadd.f32 %v993_v19, %v893_v44 }
  0xe5   : > { %v1642_v10 = vmax.f32 %v1640_v59, %v1641_v23  ;;  %v1648_v12 = vrot.slane %v1647_v30, 2  ;;  %v1655_v49 = vrot.slane %v1654_v20, 2  ;;  %v1661_v61 = vmax.f32 %v1659_v36, %v1660_v1 }
  0xe6   : > { %v1030_v34 = vadd.f32 %v4091_v56, %v1007_v63  ;;  %v1032_v37 = vadd.f32 %v4091_v56, %v1009_v31  ;;  %v995_v40 = vmul.f32 %v4081_v45, %v934_v42  ;;  %v997_v41 = vmul.f32 %v4081_v45, %v944_v25 }
  0xe7   : > { %v1643_v15 = vrot.slane %v1642_v10, 1  ;;  %v1649_v54 = vmax.f32 %v1647_v30, %v1648_v12  ;;  %v1656_v52 = vmax.f32 %v1654_v20, %v1655_v49  ;;  %v1662_v53 = vrot.slane %v1661_v61, 2 }
  0xe8   : > { %v897_v48 = vadd.f32 %v881_v0, %v781_v9  ;;  %v4220_v55 = vadd.f32 %v883_v32, %v783_v11  ;;  %v1046_v21 = vmax.f32 %v1030_v34, 0.0  ;;  %v1048_v44 = vmax.f32 %v1032_v37, 0.0  ;;  %v4233_v37 = vpop.permute.xlu1 %953 }
  0xe9   : > { %v1650_v59 = vrot.slane %v1649_v54, 1  ;;  %v1657_v60 = vrot.slane %v1656_v52, 1  ;;  %v1663_v29 = vmax.f32 %v1661_v61, %v1662_v53  ;;  %v1011_v36 = vadd.f32 %v995_v40, %v895_v47 }
  0xea   : > { %v1094_v17 = vcombine.high %v1046_v21, %v1046_v21  ;;  %v1101_v19 = vrot.slane %v1046_v21, %v4098_v5  ;;  %v1128_v23 = vcombine.high %v1048_v44, %v1048_v44  ;;  %v1135_v1 = vrot.slane %v1048_v44, %v4098_v5  ;;  %v3599_v44 = vld [vmem:[%s5087_s3] sm:$0xff]  }
  0xeb   : > { %v1644_v42 = vmax.f32 %v1642_v10, %v1643_v15  ;;  %v1651_v25 = vmax.f32 %v1649_v54, %v1650_v59  ;;  %v1658_v30 = vmax.f32 %v1656_v52, %v1657_v60  ;;  %v4224_v20 = vadd.f32 %v997_v41, %v897_v48  ;;  %v3600_v59 = vld [vmem:[%s5087_s3 + $0x8] sm:$0xff]   ;;  %3462 = vmatprep.subr.bf16.mxu0 %v3599_v44 }
  0xec   : > { %v1108_v9 = vrot.slane %v1094_v17, %v4098_v5  ;;  %v1109_v11 = vcombine.high %v1101_v19, %v1101_v19  ;;  %v1442_v0 = vsel %vm1413_vm3, %v1101_v19, -inf  ;;  %v1142_v32 = vrot.slane %v1128_v23, %v4098_v5  ;;  %3463 = vmatpush3.bf16.msra.mxu0 %v3599_v44 }
  0xed   : > { %v1664_v47 = vrot.slane %v1663_v29, 1  ;;  %v1443_v63 = vrot.slane %v1442_v0, 4  ;;  %v1143_v31 = vcombine.high %v1135_v1, %v1135_v1  ;;  %v1034_v12 = vadd.f32 %v4091_v56, %v1011_v36  ;;  %3464 = vmatprep.subr.bf16.mxu0 %v3600_v59 }
  0xee   : > { %v2078_v49 = vsel %vm2043_vm4, %v1651_v25, %v1644_v42  ;;  %v1110_v10 = vcombine.high %v1108_v9, %v1108_v9  ;;  %v1449_v61 = vsel %vm1413_vm3, %v1109_v11, -inf  ;;  %v1456_v34 = vsel %vm1413_vm3, %v1108_v9, -inf }
  0xef   : > { %v1444_v40 = vmax.f32 %v1442_v0, %v1443_v63  ;;  %v1450_v41 = vrot.slane %v1449_v61, 4  ;;  %v1457_v15 = vrot.slane %v1456_v34, 4  ;;  %v1144_v54 = vcombine.high %v1142_v32, %v1142_v32  ;;  %v4246_v63 = vpop.permute.xlu0 %742 }
  0xf0   : > { %v1463_v52 = vsel %vm1413_vm3, %v1110_v10, -inf  ;;  %v1498_v53 = vsel %vm1413_vm3, %v1135_v1, -inf  ;;  %v1505_v48 = vsel %vm1413_vm3, %v1143_v31, -inf  ;;  %v1512_v21 = vsel %vm1413_vm3, %v1142_v32, -inf  ;;  %3465 = vmatpush3.bf16.msra.mxu0 %v3600_v59 }
  0xf1   : > { %v1445_v60 = vrot.slane %v1444_v40, 2  ;;  %v1451_v36 = vmax.f32 %v1449_v61, %v1450_v41  ;;  %v1458_v17 = vmax.f32 %v1456_v34, %v1457_v15  ;;  %v1464_v19 = vrot.slane %v1463_v52, 4  ;;  %v4248_v34 = vpop.permute.xlu1 %752  ;;  %v3601_v41 = vld [vmem:[%s5087_s3 + $0x10] sm:$0xff]  }
  0xf2   : > { %v1499_v23 = vrot.slane %v1498_v53, 4  ;;  %v1506_v42 = vrot.slane %v1505_v48, 4  ;;  %v1513_v1 = vrot.slane %v1512_v21, 4  ;;  %v1519_v25 = vsel %vm1413_vm3, %v1144_v54, -inf  ;;  %3466 = vmatprep.subr.bf16.mxu0 %v3601_v41 }
  0xf3   : > { %v1665_v9 = vmax.f32 %v1663_v29, %v1664_v47  ;;  %v1446_v11 = vmax.f32 %v1444_v40, %v1445_v60  ;;  %v1452_v0 = vrot.slane %v1451_v36, 2  ;;  %v1459_v32 = vrot.slane %v1458_v17, 2 }
  0xf4   : > { %v1500_v31 = vmax.f32 %v1498_v53, %v1499_v23  ;;  %v1507_v10 = vmax.f32 %v1505_v48, %v1506_v42  ;;  %v1514_v27 = vmax.f32 %v1512_v21, %v1513_v1  ;;  %v1520_v61 = vrot.slane %v1519_v25, 4  ;;  %3467 = vmatpush3.bf16.msra.mxu0 %v3601_v41 }
  0xf5   : > { %v2079_v15 = vsel %vm2045_vm5, %v1658_v30, %v2078_v49  ;;  %v1447_v29 = vrot.slane %v1446_v11, 1  ;;  %v4254_v47 = vmax.f32 %v1451_v36, %v1452_v0  ;;  %v1050_v40 = vmax.f32 %v1034_v12, 0.0 }
  0xf6   : > { %v4256_v54 = vmax.f32 %v1463_v52, %v1464_v19  ;;  %v1501_v44 = vrot.slane %v1500_v31, 2  ;;  %v1508_v53 = vrot.slane %v1507_v10, 2  ;;  %v1515_v48 = vrot.slane %v1514_v27, 2 }
  0xf7   : > { %v4258_v21 = vmax.f32 %v1458_v17, %v1459_v32  ;;  %v4260_v60 = vmax.f32 %v1519_v25, %v1520_v61  ;;  %v1162_v23 = vcombine.high %v1050_v40, %v1050_v40  ;;  %v1169_v42 = vrot.slane %v1050_v40, %v4098_v5  ;;  %v4272_v25 = vpop.permute.xlu0 %842 }
  0xf8   : > { %v4263_v1 = vmax.f32 %v1446_v11, %v1447_v29  ;;  %v1502_v49 = vmax.f32 %v1500_v31, %v1501_v44  ;;  %v1036_v12 = vadd.f32 %v4091_v56, %v4224_v20  ;;  %v4268_v52 = vmax.f32 %v1507_v10, %v1508_v53  ;;  %v853_v31 = vpop.permute.xlu1 %852 }
  0xf9   : > { %v1176_v36 = vrot.slane %v1162_v23, %v4098_v5  ;;  %v1177_v17 = vcombine.high %v1169_v42, %v1169_v42  ;;  %v1554_v19 = vsel %vm1413_vm3, %v1169_v42, -inf  ;;  %v4274_v0 = vmax.f32 %v1514_v27, %v1515_v48 }
  0xfa   : > { %v1555_v59 = vrot.slane %v1554_v19, 4  ;;  %v1052_v11 = vmax.f32 %v1036_v12, 0.0  ;;  %v4277_v32 = vsel %vm2047_vm7, %v1665_v9, %v2079_v15  ;;  %v999_v29 = vmul.f32 %v4081_v45, %v4233_v37 }
  0xfb   : > { %v1178_v61 = vcombine.high %v1176_v36, %v1176_v36  ;;  %v1561_v20 = vsel %vm1413_vm3, %v1177_v17, -inf  ;;  %v1568_v10 = vsel %vm1413_vm3, %v1176_v36, -inf  ;;  %v1503_v40 = vrot.slane %v1502_v49, 1 }
  0xfc   : > { %v1556_v44 = vmax.f32 %v1554_v19, %v1555_v59  ;;  %v1562_v53 = vrot.slane %v1561_v20, 4  ;;  %v1569_v27 = vrot.slane %v1568_v10, 4  ;;  %v1196_v23 = vcombine.high %v1052_v11, %v1052_v11  ;;  %v763_v59 = vpop.permute.xlu0 %762 }
  0xfd   : > { %v1575_v48 = vsel %vm1413_vm3, %v1178_v61, -inf  ;;  %v1203_v9 = vrot.slane %v1052_v11, %v4098_v5  ;;  %v1015_v15 = vadd.f32 %v999_v29, %v4220_v55  ;;  %v863_v11 = vpop.permute.xlu1 %862 }
  0xfe   : > { %v1557_v12 = vrot.slane %v1556_v44, 2  ;;  %v1563_v17 = vmax.f32 %v1561_v20, %v1562_v53  ;;  %v1570_v36 = vmax.f32 %v1568_v10, %v1569_v27  ;;  %v1210_v18 = vrot.slane %v1196_v23, %v4098_v5 }
  0xff   : > { %v1211_v37 = vcombine.high %v1203_v9, %v1203_v9  ;;  %v1610_v41 = vsel %vm1413_vm3, %v1203_v9, -inf  ;;  %v1038_v19 = vadd.f32 %v4091_v56, %v1015_v15  ;;  %v1576_v30 = vrot.slane %v1575_v48, 4 }
 0x100   : > { %v1558_v22 = vmax.f32 %v1556_v44, %v1557_v12  ;;  %v1564_v61 = vrot.slane %v1563_v17, 2  ;;  %v1571_v62 = vrot.slane %v1570_v36, 2  ;;  %v1212_v24 = vcombine.high %v1210_v18, %v1210_v18 }
 0x101   : > { %v1611_v55 = vrot.slane %v1610_v41, 4  ;;  %v1617_v29 = vsel %vm1413_vm3, %v1211_v37, -inf  ;;  %v1624_v20 = vsel %vm1413_vm3, %v1210_v18, -inf  ;;  %v4292_v10 = vmax.f32 %v1502_v49, %v1503_v40  ;;  %v959_v40 = vpop.permute.xlu0 %958 }
 0x102   : > { %v1559_v53 = vrot.slane %v1558_v22, 1  ;;  %v4294_v27 = vmax.f32 %v1563_v17, %v1564_v61  ;;  %v1618_v23 = vrot.slane %v1617_v29, 4  ;;  %v1625_v15 = vrot.slane %v1624_v20, 4 }
 0x103   : > { %v1612_v9 = vmax.f32 %v1610_v41, %v1611_v55  ;;  %v1631_v44 = vsel %vm1413_vm3, %v1212_v24, -inf  ;;  %v1054_v12 = vmax.f32 %v1038_v19, 0.0  ;;  %v4297_v42 = vmax.f32 %v1570_v36, %v1571_v62  ;;  %v969_v24 = vpop.permute.xlu1 %968 }
 0x104   : > { %v4299_v8 = vmax.f32 %v1575_v48, %v1576_v30  ;;  %v1619_v13 = vmax.f32 %v1617_v29, %v1618_v23  ;;  %v1632_v3 = vrot.slane %v1631_v44, 4  ;;  %v1626_v14 = vmax.f32 %v1624_v20, %v1625_v15 }
 0x105   : > { %v1613_v37 = vrot.slane %v1612_v9, 2  ;;  %v1230_v18 = vcombine.high %v1054_v12, %v1054_v12  ;;  %v1237_v49 = vrot.slane %v1054_v12, %v4098_v5  ;;  %v4302_v17 = vmax.f32 %v1558_v22, %v1559_v53  ;;  %v979_v41 = vpop.permute.xlu0 %978 }
 0x106   : > { %v1620_v61 = vrot.slane %v1619_v13, 2  ;;  %v4305_v55 = vmax.f32 %v1631_v44, %v1632_v3  ;;  %v1627_v36 = vrot.slane %v1626_v14, 2  ;;  %v784_v29 = vmul.f32 %v4076_v38, %v4246_v63 }
 0x107   : > { %5139 = vst [vmem:[#allocation14_spill] sm:$0xff] %v4302_v17  ;;  %v1614_v62 = vmax.f32 %v1612_v9, %v1613_v37  ;;  %v1244_v30 = vrot.slane %v1230_v18, %v4098_v5  ;;  %v1245_v48 = vcombine.high %v1237_v49, %v1237_v49  ;;  %v1666_v19 = vsel %vm1413_vm3, %v1237_v49, -inf }
 0x108   : > { %v884_v22 = vmul.f32 %v4078_v39, %v4272_v25  ;;  %v886_v20 = vmul.f32 %v4078_v39, %v853_v31  ;;  %v4314_v53 = vmax.f32 %v1619_v13, %v1620_v61  ;;  %v1667_v23 = vrot.slane %v1666_v19, 4 }
 0x109   : > { %v1246_v3 = vcombine.high %v1244_v30, %v1244_v30  ;;  %v786_v9 = vmul.f32 %v4076_v38, %v4248_v34  ;;  %v1615_v15 = vrot.slane %v1614_v62, 1  ;;  %v4318_v44 = vmax.f32 %v1626_v14, %v1627_v36  ;;  %v748_v34 = vpop.permute.xlu1 %747 }
 0x10a   : > { %v1673_v12 = vsel %vm1413_vm3, %v1245_v48, -inf  ;;  %v1680_v37 = vsel %vm1413_vm3, %v1244_v30, -inf  ;;  %v1668_v63 = vmax.f32 %v1666_v19, %v1667_v23  ;;  %v900_v25 = vadd.f32 %v884_v22, %v784_v29 }
 0x10b   : > { %v1674_v18 = vrot.slane %v1673_v12, 4  ;;  %v1681_v49 = vrot.slane %v1680_v37, 4  ;;  %v1687_v13 = vsel %vm1413_vm3, %v1246_v3, -inf  ;;  %v902_v31 = vadd.f32 %v886_v20, %v786_v9 }
 0x10c   : > { %v788_v61 = vmul.f32 %v4076_v38, %v763_v59  ;;  %v888_v4 = vmul.f32 %v4078_v39, %v863_v11  ;;  %v1669_v51 = vrot.slane %v1668_v63, 2  ;;  %v1688_v17 = vrot.slane %v1687_v13, 4 }
 0x10d   : > { %v1675_v14 = vmax.f32 %v1673_v12, %v1674_v18  ;;  %v1682_v36 = vmax.f32 %v1680_v37, %v1681_v49  ;;  %v1000_v30 = vmul.f32 %v4081_v45, %v959_v40  ;;  %v1002_v19 = vmul.f32 %v4081_v45, %v969_v24 }
 0x10e   : > { %v904_v48 = vadd.f32 %v888_v4, %v788_v61  ;;  %v1004_v29 = vmul.f32 %v4081_v45, %v979_v41  ;;  %v1670_v22 = vmax.f32 %v1668_v63, %v1669_v51  ;;  %v1689_v23 = vmax.f32 %v1687_v13, %v1688_v17  ;;  %v758_v41 = vpop.permute.xlu0 %757  ;;  %v848_v63 = vpop.permute.xlu1 %847 }
 0x10f   : > { %v1676_v3 = vrot.slane %v1675_v14, 2  ;;  %v1683_v20 = vrot.slane %v1682_v36, 2  ;;  %v1016_v11 = vadd.f32 %v1000_v30, %v900_v25  ;;  %v1018_v9 = vadd.f32 %v1002_v19, %v902_v31 }
 0x110   : > { %v1020_v7 = vadd.f32 %v1004_v29, %v904_v48  ;;  %v1671_v12 = vrot.slane %v1670_v22, 1  ;;  %v1690_v49 = vrot.slane %v1689_v23, 2  ;;  %v4329_v4 = vmax.f32 %v1614_v62, %v1615_v15 }
 0x111   : > { %v1677_v37 = vmax.f32 %v1675_v14, %v1676_v3  ;;  %v1684_v18 = vmax.f32 %v1682_v36, %v1683_v20  ;;  %v1039_v40 = vadd.f32 %v4091_v56, %v1016_v11  ;;  %v1041_v24 = vadd.f32 %v4091_v56, %v1018_v9 }
 0x112   : > { %5140 = vst [vmem:[#allocation15_spill] sm:$0xff] %v4329_v4  ;;  %v1043_v51 = vadd.f32 %v4091_v56, %v1020_v7  ;;  %v1672_v17 = vmax.f32 %v1670_v22, %v1671_v12  ;;  %v4334_v25 = vmax.f32 %v1689_v23, %v1690_v49  ;;  %v785_v36 = vmul.f32 %v4076_v38, %v748_v34 }
 0x113   : > { %v1678_v13 = vrot.slane %v1677_v37, 1  ;;  %v1685_v61 = vrot.slane %v1684_v18, 1  ;;  %v1055_v31 = vmax.f32 %v1039_v40, 0.0  ;;  %v1057_v48 = vmax.f32 %v1041_v24, 0.0 }
 0x114   : > { %5141 = vst [vmem:[#allocation16_spill] sm:$0xff] %v4334_v25  ;;  %v1059_v14 = vmax.f32 %v1043_v51, 0.0  ;;  %v4342_v30 = vmul.f32 %v4076_v38, %v758_v41  ;;  %v885_v7 = vmul.f32 %v4078_v39, %v848_v63  ;;  %v4350_v34 = vsel %vm2049_vm8, %v1672_v17, %v4277_v32 }
 0x115   : > { %v4337_v62 = vmax.f32 %v1677_v37, %v1678_v13  ;;  %v4339_v15 = vmax.f32 %v1684_v18, %v1685_v61  ;;  %v1247_v56 = vcombine.high %v1055_v31, %v1055_v31  ;;  %v1254_v19 = vrot.slane %v1055_v31, %v4098_v5  ;;  %5145 = vst [vmem:[#allocation20_spill] sm:$0xff] %v4350_v34 }
 0x116   : > { %5144 = vst [vmem:[#allocation19_spill] sm:$0xff] %v4342_v30  ;;  %v1281_v29 = vcombine.high %v1057_v48, %v1057_v48  ;;  %v1288_v22 = vrot.slane %v1057_v48, %v4098_v5  ;;  %v1315_v20 = vcombine.high %v1059_v14, %v1059_v14  ;;  %v4353_v23 = vrot.slane %v1059_v14, %v4098_v5 }
 0x117   : > { %5142 = vst [vmem:[#allocation17_spill] sm:$0xff] %v4337_v62  ;;  %5143 = vst [vmem:[#allocation18_spill] sm:$0xff] %v4339_v15  ;;  %v1261_v11 = vrot.slane %v1247_v56, %v4098_v5  ;;  %v1262_v9 = vcombine.high %v1254_v19, %v1254_v19  ;;  %v1694_v12 = vsel %vm1413_vm3, %v1254_v19, -inf  ;;  %v4359_v24 = vadd.f32 %v885_v7, %v785_v36 }
 0x118   : > { %v1295_v37 = vrot.slane %v1281_v29, %v4098_v5  ;;  %v1695_v18 = vrot.slane %v1694_v12, 4  ;;  %v1296_v49 = vcombine.high %v1288_v22, %v1288_v22  ;;  %v1750_v40 = vsel %vm1413_vm3, %v1288_v22, -inf }
 0x119   : > { %5146 = vst [vmem:[#allocation21_spill] sm:$0xff] %v4359_v24  ;;  %v1263_v51 = vcombine.high %v1261_v11, %v1261_v11  ;;  %v1701_v32 = vsel %vm1413_vm3, %v1262_v9, -inf  ;;  %v1708_v41 = vsel %vm1413_vm3, %v1261_v11, -inf  ;;  %v1751_v31 = vrot.slane %v1750_v40, 4 }
 0x11a   : > { %v1297_v63 = vcombine.high %v1295_v37, %v1295_v37  ;;  %v1696_v17 = vmax.f32 %v1694_v12, %v1695_v18  ;;  %v1702_v13 = vrot.slane %v1701_v32, 4  ;;  %v1709_v61 = vrot.slane %v1708_v41, 4 }
 0x11b   : > { %v1715_v48 = vsel %vm1413_vm3, %v1263_v51, -inf  ;;  %v1757_v14 = vsel %vm1413_vm3, %v1296_v49, -inf  ;;  %v1764_v56 = vsel %vm1413_vm3, %v1295_v37, -inf  ;;  %v1752_v9 = vmax.f32 %v1750_v40, %v1751_v31 }
 0x11c   : > { %v1771_v19 = vsel %vm1413_vm3, %v1297_v63, -inf  ;;  %v1697_v36 = vrot.slane %v1696_v17, 2  ;;  %v1703_v7 = vmax.f32 %v1701_v32, %v1702_v13  ;;  %v1710_v29 = vmax.f32 %v1708_v41, %v1709_v61 }
 0x11d   : > { %v1716_v22 = vrot.slane %v1715_v48, 4  ;;  %v1758_v3 = vrot.slane %v1757_v14, 4  ;;  %v1765_v11 = vrot.slane %v1764_v56, 4  ;;  %v1772_v59 = vrot.slane %v1771_v19, 4 }
 0x11e   : > { %v1698_v12 = vmax.f32 %v1696_v17, %v1697_v36  ;;  %v1704_v18 = vrot.slane %v1703_v7, 2  ;;  %v1711_v15 = vrot.slane %v1710_v29, 2  ;;  %v1753_v34 = vrot.slane %v1752_v9, 2 }
 0x11f   : > { %v1717_v62 = vmax.f32 %v1715_v48, %v1716_v22  ;;  %v1759_v51 = vmax.f32 %v1757_v14, %v1758_v3  ;;  %v1766_v24 = vmax.f32 %v1764_v56, %v1765_v11  ;;  %v1773_v49 = vmax.f32 %v1771_v19, %v1772_v59 }
 0x120   : > { %v1699_v25 = vrot.slane %v1698_v12, 1  ;;  %v1705_v37 = vmax.f32 %v1703_v7, %v1704_v18  ;;  %v1712_v45 = vmax.f32 %v1710_v29, %v1711_v15  ;;  %v1754_v4 = vmax.f32 %v1752_v9, %v1753_v34 }
 0x121   : > { %v1718_v63 = vrot.slane %v1717_v62, 2  ;;  %v1760_v32 = vrot.slane %v1759_v51, 2  ;;  %v1767_v41 = vrot.slane %v1766_v24, 2  ;;  %v1774_v13 = vrot.slane %v1773_v49, 2 }
 0x122   : > { %v1706_v40 = vrot.slane %v1705_v37, 1  ;;  %v1713_v61 = vrot.slane %v1712_v45, 1  ;;  %v1329_v17 = vrot.slane %v1315_v20, %v4098_v5  ;;  %v1755_v36 = vrot.slane %v1754_v4, 1 }
 0x123   : > { %v1719_v31 = vmax.f32 %v1717_v62, %v1718_v63  ;;  %v1761_v30 = vmax.f32 %v1759_v51, %v1760_v32  ;;  %v1768_v48 = vmax.f32 %v1766_v24, %v1767_v41  ;;  %v1775_v22 = vmax.f32 %v1773_v49, %v1774_v13 }
 0x124   : > { %v1707_v3 = vmax.f32 %v1705_v37, %v1706_v40  ;;  %v1330_v59 = vcombine.high %v4353_v23, %v4353_v23  ;;  %v5147_v15 = vrot.slane %v4254_v47, 1  ;;  %v1700_v56 = vmax.f32 %v1698_v12, %v1699_v25 }
 0x125   : > { %v1720_v14 = vrot.slane %v1719_v31, 1  ;;  %v4373_v19 = vmax.f32 %v1712_v45, %v1713_v61  ;;  %v1762_v7 = vrot.slane %v1761_v30, 1  ;;  %v1769_v62 = vrot.slane %v1768_v48, 1 }
 0x126   : > { %v1455_v34 = vmax.f32 %v4254_v47, %v5147_v15  ;;  %v1756_v20 = vmax.f32 %v1754_v4, %v1755_v36  ;;  %v1776_v29 = vrot.slane %v1775_v22, 1  ;;  %v1331_v9 = vcombine.high %v1329_v17, %v1329_v17 }
 0x127   : > { %v1806_v24 = vsel %vm1413_vm3, %v4353_v23, -inf  ;;  %v4377_v11 = vmax.f32 %v1719_v31, %v1720_v14  ;;  %v4380_v18 = vsel %vm2043_vm4, %v1707_v3, %v1700_v56  ;;  %v1763_v51 = vmax.f32 %v1761_v30, %v1762_v7  ;;  %v3602_v7 = vld [vmem:[%s5087_s3 + $0x18] sm:$0xff]  }
 0x128   : > { %v1807_v47 = vrot.slane %v1806_v24, 4  ;;  %v1813_v45 = vsel %vm1413_vm3, %v1330_v59, -inf  ;;  %v1820_v25 = vsel %vm1413_vm3, %v1329_v17, -inf  ;;  %v1827_v4 = vsel %vm1413_vm3, %v1331_v9, -inf  ;;  %3468 = vmatprep.subr.bf16.mxu0 %v3602_v7 }
 0x129   : > { %v1461_v12 = vrot.slane %v4258_v21, 1  ;;  %v4386_v49 = vmax.f32 %v1768_v48, %v1769_v62  ;;  %v1814_v37 = vrot.slane %v1813_v45, 4  ;;  %v1821_v63 = vrot.slane %v1820_v25, 4  ;;  %3469 = vmatpush3.bf16.msra.mxu0 %v3602_v7 }
 0x12a   : > { %v1808_v23 = vmax.f32 %v1806_v24, %v1807_v47  ;;  %v4388_v32 = vmax.f32 %v1775_v22, %v1776_v29  ;;  %v4391_v41 = vsel %vm2043_vm4, %v1763_v51, %v1756_v20  ;;  %v1828_v30 = vrot.slane %v1827_v4, 4 }
 0x12b   : > { %v1466_v13 = vrot.slane %v4256_v54, 2  ;;  %v1815_v61 = vmax.f32 %v1813_v45, %v1814_v37  ;;  %v1822_v31 = vmax.f32 %v1820_v25, %v1821_v63  ;;  %v1462_v17 = vmax.f32 %v4258_v21, %v1461_v12 }
 0x12c   : > { %v1809_v40 = vrot.slane %v1808_v23, 2  ;;  %v1829_v36 = vmax.f32 %v1827_v4, %v1828_v30  ;;  %v1522_v3 = vrot.slane %v4260_v60, 2  ;;  %v2046_v22 = vsel %vm2045_vm5, %v4156_v26, %v4174_v50 }
 0x12d   : > { %v1467_v48 = vmax.f32 %v4256_v54, %v1466_v13  ;;  %v1816_v59 = vrot.slane %v1815_v61, 2  ;;  %v1823_v15 = vrot.slane %v1822_v31, 2  ;;  %v1517_v56 = vrot.slane %v4274_v0, 1 }
 0x12e   : > { %v1810_v14 = vmax.f32 %v1808_v23, %v1809_v40  ;;  %v1830_v62 = vrot.slane %v1829_v36, 2  ;;  %v1523_v20 = vmax.f32 %v4260_v60, %v1522_v3  ;;  %v2048_v54 = vsel %vm2047_vm7, %v4171_v46, %v2046_v22 }
 0x12f   : > { %v1468_v21 = vrot.slane %v1467_v48, 1  ;;  %v1817_v9 = vmax.f32 %v1815_v61, %v1816_v59  ;;  %v1824_v24 = vmax.f32 %v1822_v31, %v1823_v15  ;;  %v2050_v26 = vsel %vm2049_vm8, %v4263_v1, %v2048_v54 }
 0x130   : > { %v1811_v29 = vrot.slane %v1810_v14, 1  ;;  %v1831_v50 = vmax.f32 %v1829_v36, %v1830_v62  ;;  %v1524_v47 = vrot.slane %v1523_v20, 1  ;;  %v2052_v45 = vsel %vm2051_vm9, %v1455_v34, %v2050_v26  ;;  %v858_v34 = vpop.permute.xlu0 %857 }
 0x131   : > { %v1469_v51 = vmax.f32 %v1467_v48, %v1468_v21  ;;  %v1818_v25 = vrot.slane %v1817_v9, 1  ;;  %v1825_v4 = vrot.slane %v1824_v24, 1  ;;  %v5148_v60 = vrot.slane %v4268_v52, 1 }
 0x132   : > { %v2054_v46 = vsel %vm2053_vm10, %v1462_v17, %v2052_v45  ;;  %v1832_v23 = vrot.slane %v1831_v50, 1  ;;  %v1518_v37 = vmax.f32 %v4274_v0, %v1517_v56  ;;  %v2058_v63 = vsel %vm2045_vm5, %v4142_v6, %v4148_v35  ;;  %v5152_v45 = vld [vmem:[#allocation14_spill] sm:$0xff] }
 0x133   : > { %v1511_v12 = vmax.f32 %v4268_v52, %v5148_v60  ;;  %v4416_v1 = vsel %vm2055_vm11, %v1469_v51, %v2054_v46  ;;  %v1812_v30 = vmax.f32 %v1810_v14, %v1811_v29  ;;  %v1819_v13 = vmax.f32 %v1817_v9, %v1818_v25  ;;  %v768_v52 = vpop.permute.xlu1 %767  ;;  %v5154_v60 = vld [vmem:[#allocation19_spill] sm:$0xff] }
 0x134   : > { %v1525_v40 = vmax.f32 %v1523_v20, %v1524_v47  ;;  %v2059_v61 = vsel %vm2047_vm7, %v4145_v16, %v2058_v63  ;;  %v4423_v31 = vmax.f32 %v1824_v24, %v1825_v4  ;;  %v4425_v17 = vmax.f32 %v1831_v50, %v1832_v23  ;;  %v868_v50 = vpop.permute.xlu0 %867  ;;  %v5153_v4 = vld [vmem:[#allocation13_spill] sm:$0xff] }
 0x135   : > { %v2060_v0 = vsel %vm2049_vm8, %v4292_v10, %v2059_v61  ;;  %v2114_v36 = vrot.slane %v4416_v1, 7  ;;  %v4431_v48 = vsel %vm2043_vm4, %v1819_v13, %v1812_v30  ;;  %v2146_v35 = vrot.slane %v4416_v1, 1 }
 0x136   : > { %v2061_v6 = vsel %vm2051_vm9, %v1511_v12, %v2060_v0  ;;  %v887_v3 = vmul.f32 %v4078_v39, %v858_v34  ;;  %v789_v22 = vmul.f32 %v4076_v38, %v768_v52  ;;  %v1573_v14 = vrot.slane %v4297_v42, 1  ;;  %v5158_v52 = vld [vmem:[#allocation12_spill] sm:$0xff] }
 0x137   : > { %v2062_v16 = vsel %vm2053_vm10, %v1518_v37, %v2061_v6  ;;  %v1578_v59 = vrot.slane %v4299_v8, 2  ;;  %v5149_v15 = vrot.slane %v4294_v27, 1  ;;  %v1629_v7 = vrot.slane %v4318_v44, 1  ;;  %v964_v51 = vpop.permute.xlu1 %963 }
 0x138   : > { %v4441_v10 = vsel %vm2055_vm11, %v1525_v40, %v2062_v16  ;;  %v1634_v62 = vrot.slane %v4305_v55, 2  ;;  %v1574_v20 = vmax.f32 %v4297_v42, %v1573_v14  ;;  %v5150_v54 = vrot.slane %v4314_v53, 1 }
 0x139   : > { %v1567_v56 = vmax.f32 %v4294_v27, %v5149_v15  ;;  %v2147_v21 = vrot.slane %v4441_v10, 1  ;;  %v3549_v38 = vpack.i.bf16 %v4441_v10, %v4416_v1  ;;  %v1579_v9 = vmax.f32 %v4299_v8, %v1578_v59  ;;  %v974_v59 = vpop.permute.xlu0 %973 }
 0x13a   : > { %v1623_v29 = vmax.f32 %v4314_v53, %v5150_v54  ;;  %v1630_v24 = vmax.f32 %v4318_v44, %v1629_v7  ;;  %v1635_v27 = vmax.f32 %v4305_v55, %v1634_v62  ;;  %v2065_v26 = vsel %vm2045_vm5, %v4193_v33, %v4203_v28  ;;  %v5151_v44 = vld [vmem:[#allocation8_spill] sm:$0xff]  ;;  %v3603_v33 = vld [vmem:[%s5087_s3 + $0x20] sm:$0xff]  }
 0x13b   : > { %3550 = vrot.lane.b32.xlu0 %v3549_v38, %s3694_s26  ;;  %v2066_v42 = vsel %vm2047_vm7, %v4200_v43, %v2065_v26  ;;  %v2072_v8 = vsel %vm2045_vm5, %v4176_v58, %v4182_v57  ;;  %v1879_v53 = vand.u32 7, %v3800_v2  ;;  %v1886_v55 = vand.u32 7, %v5151_v44  ;;  %v5155_v57 = vld [vmem:[#allocation15_spill] sm:$0xff]  ;;  %3470 = vmatprep.subr.bf16.mxu0 %v3603_v33  ;;  %v984_v15 = vpop.permute.xlu1 %983  ;;  %v5161_v62 = vld [vmem:[#allocation16_spill] sm:$0xff] }
 0x13c   : > { %v1580_v28 = vrot.slane %v1579_v9, 1  ;;  %v1636_v47 = vrot.slane %v1635_v27, 1  ;;  %v2067_v25 = vsel %vm2049_vm8, %v5152_v45, %v2066_v42  ;;  %v2073_v43 = vsel %vm2047_vm7, %v5153_v4, %v2072_v8  ;;  %3471 = vmatpush3.bf16.msra.mxu0 %v3603_v33  ;;  %v5166_v8 = vld [vmem:[#allocation20_spill] sm:$0xff]  ;;  %v5167_v33 = vld [vmem:[#allocation17_spill] sm:$0xff] }
 0x13d   : > { %v903_v12 = vadd.f32 %v887_v3, %v5154_v60  ;;  %v2068_v58 = vsel %vm2051_vm9, %v1567_v56, %v2067_v25  ;;  %v2074_v46 = vsel %vm2049_vm8, %v5155_v57, %v2073_v43  ;;  %vm4482_vm12 = vcmp.eq.s32.totalorder %v1879_v53, 7  ;;  %v3627_v25 = vld [vmem:[%s5086_s2] ss:$0 sm:$0xff]  ;;  %v5168_v43 = vld [vmem:[#allocation18_spill] sm:$0xff] }
 0x13e   : > { %v1581_v37 = vmax.f32 %v1579_v9, %v1580_v28  ;;  %v1637_v63 = vmax.f32 %v1635_v27, %v1636_v47  ;;  %v2069_v34 = vsel %vm2053_vm10, %v1574_v20, %v2068_v58  ;;  %v2075_v30 = vsel %vm2051_vm9, %v1623_v29, %v2074_v46  ;;  %v5163_v9 = vld [vmem:[#allocation21_spill] sm:$0xff]  ;;  %v5164_v27 = vld [vmem:[#allocation6_spill] sm:$0xff] }
 0x13f   : > { %v2076_v13 = vsel %vm2053_vm10, %v1630_v24, %v2075_v30  ;;  %v2160_v40 = vsel %vm656_vm6, %v2146_v35, %v2147_v21  ;;  %v889_v61 = vmul.f32 %v4078_v39, %v868_v50  ;;  %v1001_v0 = vmul.f32 %v5158_v52, %v964_v51  ;;  %v3604_v50 = vld [vmem:[%s5087_s3 + $0x28] sm:$0xff]   ;;  %v5165_v51 = vld [vmem:[#allocation9_spill] sm:$0xff] }
 0x140   : > { %v2115_v6 = vrot.slane %v4441_v10, 7  ;;  %v4497_v3 = vsel %vm2055_vm11, %v1581_v37, %v2069_v34  ;;  %v4500_v16 = vsel %vm2055_vm11, %v1637_v63, %v2076_v13  ;;  %vm4504_vm13 = vcmp.eq.s32.totalorder %v1886_v55, 7  ;;  %3472 = vmatprep.subr.bf16.mxu0 %v3604_v50 }
 0x141   : > { %v2149_v39 = vrot.slane %v4500_v16, 1  ;;  %v3554_v56 = vpack.i.bf16 %v4500_v16, %v4497_v3  ;;  %v2162_v7 = vsel %vm4482_vm12, 0.0, %v2160_v40  ;;  %v5162_v38 = vrot.slane %v5161_v62, 1  ;;  %3473 = vmatpush3.bf16.msra.mxu0 %v3604_v50 }
 0x142   : > { %v2148_v54 = vrot.slane %v4497_v3, 1  ;;  %v905_v29 = vadd.f32 %v889_v61, %v789_v22  ;;  %v1017_v24 = vadd.f32 %v1001_v0, %v5163_v9  ;;  %v1893_v26 = vand.u32 7, %v5164_v27 }
 0x143   : > { %v1693_v20 = vmax.f32 %v5161_v62, %v5162_v38  ;;  %3555 = vrot.lane.b32.xlu1 %v3554_v56, %s3694_s26  ;;  %v1900_v42 = vand.u32 7, %v5165_v51  ;;  %v2082_v28 = vsel %vm2051_vm9, %v5167_v33, %v5166_v8  ;;  %v1003_v47 = vmul.f32 %v5158_v52, %v974_v59 }
 0x144   : > { %v1005_v22 = vmul.f32 %v5158_v52, %v984_v15  ;;  %v2159_v45 = vsel %vm656_vm6, %v2147_v21, %v2148_v54  ;;  %v1040_v4 = vadd.f32 %v3627_v25, %v1017_v24  ;;  %v2083_v60 = vsel %vm2053_vm10, %v5168_v43, %v2082_v28 }
 0x145   : > { %vm4538_vm14 = vcmp.eq.s32.totalorder %v1893_v26, 7  ;;  %v2163_v57 = vsel %vm4504_vm13, 0.0, %v2159_v45  ;;  %v4545_v21 = vsel %vm2055_vm11, %v1693_v20, %v2083_v60  ;;  %vm4549_vm15 = vcmp.eq.s32.totalorder %v1900_v42, 7 }
 0x146   : > { %v2158_v23 = vsel %vm656_vm6, %v2148_v54, %v2149_v39  ;;  %v3559_v37 = vpack.i.bf16 %v2163_v57, %v2162_v7  ;;  %v1056_v63 = vmax.f32 %v1040_v4, 0.0  ;;  %v2150_v34 = vrot.slane %v4545_v21, 1 }
 0x147   : > { %v2164_v30 = vsel %vm4538_vm14, 0.0, %v2158_v23  ;;  %v1019_v13 = vadd.f32 %v1003_v47, %v903_v12  ;;  %v1021_v40 = vadd.f32 %v1005_v22, %v905_v29  ;;  %v2086_v61 = vsel %vm2045_vm5, %v4373_v19, %v4380_v18 }
 0x148   : > { %v2093_v52 = vsel %vm2045_vm5, %v4386_v49, %v4391_v41  ;;  %3560 = vrot.lane.b32.xlu0 %v3559_v37, %s3695_s21  ;;  %v1264_v0 = vcombine.high %v1056_v63, %v1056_v63  ;;  %v1271_v14 = vrot.slane %v1056_v63, %v4098_v5  ;;  %v2157_v12 = vsel %vm656_vm6, %v2149_v39, %v2150_v34 }
 0x149   : > { %v4572_v59 = vsel %vm2047_vm7, %v4377_v11, %v2086_v61  ;;  %v2165_v19 = vsel %vm4549_vm15, 0.0, %v2157_v12  ;;  %v1042_v18 = vadd.f32 %v3627_v25, %v1019_v13  ;;  %v1044_v49 = vadd.f32 %v3627_v25, %v1021_v40 }
 0x14a   : > { %v4578_v41 = vsel %vm2047_vm7, %v4388_v32, %v2093_v52  ;;  %v1278_v15 = vrot.slane %v1264_v0, %v4098_v5  ;;  %v1279_v56 = vcombine.high %v1271_v14, %v1271_v14  ;;  %v1722_v7 = vsel %vm1413_vm3, %v1271_v14, -inf }
 0x14b   : > { %v3569_v62 = vpack.i.bf16 %v2165_v19, %v2164_v30  ;;  %v1723_v39 = vrot.slane %v1722_v7, 4  ;;  %v1058_v38 = vmax.f32 %v1042_v18, 0.0  ;;  %v1060_v20 = vmax.f32 %v1044_v49, 0.0 }
 0x14c   : > { %v2100_v11 = vsel %vm2045_vm5, %v4423_v31, %v4431_v48  ;;  %v1280_v54 = vcombine.high %v1278_v15, %v1278_v15  ;;  %v1729_v29 = vsel %vm1413_vm3, %v1279_v56, -inf  ;;  %v1736_v9 = vsel %vm1413_vm3, %v1278_v15, -inf }
 0x14d   : > { %3570 = vrot.lane.b32.xlu1 %v3569_v62, %s3695_s21  ;;  %v4590_v32 = vsel %vm2047_vm7, %v4425_v17, %v2100_v11  ;;  %v1724_v24 = vmax.f32 %v1722_v7, %v1723_v39  ;;  %v1730_v50 = vrot.slane %v1729_v29, 4  ;;  %v1737_v8 = vrot.slane %v1736_v9, 4 }
 0x14e   : > { %v1298_v33 = vcombine.high %v1058_v38, %v1058_v38  ;;  %v1743_v28 = vsel %vm1413_vm3, %v1280_v54, -inf  ;;  %v1305_v47 = vrot.slane %v1058_v38, %v4098_v5  ;;  %v1332_v31 = vcombine.high %v1060_v20, %v1060_v20 }
 0x14f   : > { %v1339_v48 = vrot.slane %v1060_v20, %v4098_v5  ;;  %v1725_v22 = vrot.slane %v1724_v24, 2  ;;  %v1731_v45 = vmax.f32 %v1729_v29, %v1730_v50  ;;  %v1738_v25 = vmax.f32 %v1736_v9, %v1737_v8 }
 0x150   : > { %v1744_v4 = vrot.slane %v1743_v28, 4  ;;  %v1312_v43 = vrot.slane %v1298_v33, %v4098_v5  ;;  %v1313_v60 = vcombine.high %v1305_v47, %v1305_v47  ;;  %v1778_v17 = vsel %vm1413_vm3, %v1305_v47, -inf }
 0x151   : > { %v1346_v58 = vrot.slane %v1332_v31, %v4098_v5  ;;  %v1726_v57 = vmax.f32 %v1724_v24, %v1725_v22  ;;  %v1732_v46 = vrot.slane %v1731_v45, 2  ;;  %v1739_v23 = vrot.slane %v1738_v25, 2 }
 0x152   : > { %v1745_v37 = vmax.f32 %v1743_v28, %v1744_v4  ;;  %v1314_v63 = vcombine.high %v1312_v43, %v1312_v43  ;;  %v1779_v30 = vrot.slane %v1778_v17, 4  ;;  %v1785_v13 = vsel %vm1413_vm3, %v1313_v60, -inf }
 0x153   : > { %v1792_v40 = vsel %vm1413_vm3, %v1312_v43, -inf  ;;  %v1727_v61 = vrot.slane %v1726_v57, 1  ;;  %v1733_v52 = vmax.f32 %v1731_v45, %v1732_v46  ;;  %v1740_v0 = vmax.f32 %v1738_v25, %v1739_v23 }
 0x154   : > { %v1786_v14 = vrot.slane %v1785_v13, 4  ;;  %v1780_v12 = vmax.f32 %v1778_v17, %v1779_v30  ;;  %v1793_v19 = vrot.slane %v1792_v40, 4  ;;  %v1799_v18 = vsel %vm1413_vm3, %v1314_v63, -inf }
 0x155   : > { %v1347_v49 = vcombine.high %v1339_v48, %v1339_v48  ;;  %v1728_v15 = vmax.f32 %v1726_v57, %v1727_v61  ;;  %v1734_v56 = vrot.slane %v1733_v52, 1  ;;  %v1800_v62 = vrot.slane %v1799_v18, 4 }
 0x156   : > { %v1787_v7 = vmax.f32 %v1785_v13, %v1786_v14  ;;  %v1781_v39 = vrot.slane %v1780_v12, 2  ;;  %v1794_v38 = vmax.f32 %v1792_v40, %v1793_v19  ;;  %v1348_v20 = vcombine.high %v1346_v58, %v1346_v58 }
 0x157   : > { %v1834_v11 = vsel %vm1413_vm3, %v1339_v48, -inf  ;;  %v1801_v29 = vmax.f32 %v1799_v18, %v1800_v62  ;;  %v1841_v24 = vsel %vm1413_vm3, %v1347_v49, -inf  ;;  %v1848_v28 = vsel %vm1413_vm3, %v1346_v58, -inf }
 0x158   : > { %v1788_v54 = vrot.slane %v1787_v7, 2  ;;  %v1835_v9 = vrot.slane %v1834_v11, 4  ;;  %v1782_v50 = vmax.f32 %v1780_v12, %v1781_v39  ;;  %v1795_v8 = vrot.slane %v1794_v38, 2 }
 0x159   : > { %v1842_v33 = vrot.slane %v1841_v24, 4  ;;  %v1849_v22 = vrot.slane %v1848_v28, 4  ;;  %v1855_v45 = vsel %vm1413_vm3, %v1348_v20, -inf  ;;  %v1735_v46 = vmax.f32 %v1733_v52, %v1734_v56 }
 0x15a   : > { %v1789_v47 = vmax.f32 %v1787_v7, %v1788_v54  ;;  %v1836_v31 = vmax.f32 %v1834_v11, %v1835_v9  ;;  %v1783_v25 = vrot.slane %v1782_v50, 1  ;;  %v1796_v4 = vmax.f32 %v1794_v38, %v1795_v8 }
 0x15b   : > { %v1843_v43 = vmax.f32 %v1841_v24, %v1842_v33  ;;  %v1856_v60 = vrot.slane %v1855_v45, 4  ;;  %v1850_v57 = vmax.f32 %v1848_v28, %v1849_v22  ;;  %v1741_v13 = vrot.slane %v1740_v0, 1 }
 0x15c   : > { %v1790_v48 = vrot.slane %v1789_v47, 1  ;;  %v1837_v17 = vrot.slane %v1836_v31, 2  ;;  %v1784_v23 = vmax.f32 %v1782_v50, %v1783_v25  ;;  %v1746_v58 = vrot.slane %v1745_v37, 2 }
 0x15d   : > { %v1844_v63 = vrot.slane %v1843_v43, 2  ;;  %v1857_v30 = vmax.f32 %v1855_v45, %v1856_v60  ;;  %v1851_v61 = vrot.slane %v1850_v57, 2  ;;  %v2088_v14 = vsel %vm2049_vm8, %v1728_v15, %v4572_v59 }
 0x15e   : > { %v1838_v40 = vmax.f32 %v1836_v31, %v1837_v17  ;;  %v1742_v19 = vmax.f32 %v1740_v0, %v1741_v13  ;;  %v2089_v18 = vsel %vm2051_vm9, %v1735_v46, %v2088_v14  ;;  %v1791_v49 = vmax.f32 %v1789_v47, %v1790_v48  ;;  %v5181_v13 = vld [vmem:[#allocation7_spill] sm:$0xff] }
 0x15f   : > { %v1845_v12 = vmax.f32 %v1843_v43, %v1844_v63  ;;  %v1852_v62 = vmax.f32 %v1850_v57, %v1851_v61  ;;  %v1747_v39 = vmax.f32 %v1745_v37, %v1746_v58  ;;  %v1797_v38 = vrot.slane %v1796_v4, 1  ;;  %v5173_v57 = vld [vmem:[#allocation5_spill] sm:$0xff]  ;;  %v5177_v63 = vld [vmem:[#allocation10_spill] sm:$0xff] }
 0x160   : > { %v1839_v7 = vrot.slane %v1838_v40, 1  ;;  %v2090_v56 = vsel %vm2053_vm10, %v1742_v19, %v2089_v18  ;;  %v1802_v20 = vrot.slane %v1801_v29, 2  ;;  %v1858_v11 = vrot.slane %v1857_v30, 2 }
 0x161   : > { %v1846_v52 = vrot.slane %v1845_v12, 1  ;;  %v1748_v9 = vrot.slane %v1747_v39, 1  ;;  %v1798_v24 = vmax.f32 %v1796_v4, %v1797_v38  ;;  %v1853_v50 = vrot.slane %v1852_v62, 1 }
 0x162   : > { %v1840_v54 = vmax.f32 %v1838_v40, %v1839_v7  ;;  %v1803_v8 = vmax.f32 %v1801_v29, %v1802_v20  ;;  %v1859_v15 = vmax.f32 %v1857_v30, %v1858_v11  ;;  %v2095_v0 = vsel %vm2049_vm8, %v1784_v23, %v4578_v41  ;;  %v5189_v7 = vld [vmem:[#allocation11_spill] sm:$0xff] }
 0x163   : > { %v1847_v59 = vmax.f32 %v1845_v12, %v1846_v52  ;;  %v1749_v33 = vmax.f32 %v1747_v39, %v1748_v9  ;;  %v1854_v28 = vmax.f32 %v1852_v62, %v1853_v50  ;;  %v2096_v37 = vsel %vm2051_vm9, %v1791_v49, %v2095_v0 }
 0x164   : > { %v2102_v47 = vsel %vm2049_vm8, %v1840_v54, %v4590_v32  ;;  %v2117_v31 = vrot.slane %v4500_v16, 7  ;;  %v1804_v22 = vrot.slane %v1803_v8, 1  ;;  %v1860_v45 = vrot.slane %v1859_v15, 1 }
 0x165   : > { %v2103_v25 = vsel %vm2051_vm9, %v1847_v59, %v2102_v47  ;;  %v2116_v29 = vrot.slane %v4497_v3, 7  ;;  %v2091_v4 = vsel %vm2055_vm11, %v1749_v33, %v2090_v56  ;;  %v2097_v43 = vsel %vm2053_vm10, %v1798_v24, %v2096_v37 }
 0x166   : > { %v2104_v41 = vsel %vm2053_vm10, %v1854_v28, %v2103_v25  ;;  %v3564_v60 = vpack.i.bf16 %v2091_v4, %v4545_v21  ;;  %v2151_v48 = vrot.slane %v2091_v4, 1  ;;  %v1805_v17 = vmax.f32 %v1803_v8, %v1804_v22 }
 0x167   : > { %v5174_v32 = vand.u32 7, %v5173_v57  ;;  %v2119_v46 = vrot.slane %v2091_v4, 7  ;;  %v1861_v23 = vmax.f32 %v1859_v15, %v1860_v45  ;;  %v5178_v3 = vand.u32 7, %v5177_v63 }
 0x168   : > { %v5182_v40 = vand.u32 7, %v5181_v13  ;;  %3565 = vrot.lane.b32.xlu0 %v3564_v60, %s3694_s26  ;;  %v2098_v58 = vsel %vm2055_vm11, %v1805_v17, %v2097_v43  ;;  %vm4643_vm12 = vcmp.eq.s32.totalorder %v1893_v26, 0  ;;  %vm4649_vm13 = vcmp.eq.s32.totalorder %v1900_v42, 0 }
 0x169   : > { %vm4623_vm1 = vcmp.eq.s32.totalorder %v5174_v32, 7  ;;  %vm4629_vm2 = vcmp.eq.s32.totalorder %v5178_v3, 7  ;;  %v2126_v19 = vsel %vm591_vm0, %v2116_v29, %v2117_v31  ;;  %v2105_v18 = vsel %vm2055_vm11, %v1861_v23, %v2104_v41 }
 0x16a   : > { %vm4635_vm3 = vcmp.eq.s32.totalorder %v5182_v40, 7  ;;  %v2152_v49 = vrot.slane %v2098_v58, 1  ;;  %v2156_v26 = vsel %vm656_vm6, %v2150_v34, %v2151_v48  ;;  %v5190_v62 = vand.u32 7, %v5189_v7 }
 0x16b   : > { %v3574_v42 = vpack.i.bf16 %v2105_v18, %v2098_v58  ;;  %v2121_v38 = vrot.slane %v2105_v18, 7  ;;  %v2153_v52 = vrot.slane %v2105_v18, 1  ;;  %v2127_v56 = vsel %vm591_vm0, %v2115_v6, %v2116_v29 }
 0x16c   : > { %vm4662_vm14 = vcmp.eq.s32.totalorder %v5190_v62, 7  ;;  %v2120_v20 = vrot.slane %v2098_v58, 7  ;;  %v2155_v11 = vsel %vm656_vm6, %v2151_v48, %v2152_v49  ;;  %v2132_v34 = vsel %vm4643_vm12, 0.0, %v2127_v56 }
 0x16d   : > { %v2133_v54 = vsel %vm4649_vm13, 0.0, %v2126_v19  ;;  %3575 = vrot.lane.b32.xlu1 %v3574_v42, %s3694_s26  ;;  %v2166_v9 = vsel %vm4623_vm1, 0.0, %v2156_v26  ;;  %v2167_v24 = vsel %vm4629_vm2, 0.0, %v2155_v11  ;;  %v2154_v50 = vsel %vm656_vm6, %v2152_v49, %v2153_v52 }
 0x16e   : > { %v2161_v8 = vsel %vm656_vm6, %v2153_v52, %v2146_v35  ;;  %v3579_v59 = vpack.i.bf16 %v2167_v24, %v2166_v9  ;;  %v2168_v15 = vsel %vm4635_vm3, 0.0, %v2154_v50  ;;  %vm4693_vm15 = vcmp.eq.s32.totalorder %v1879_v53, 0 }
 0x16f   : > { %v2169_v0 = vsel %vm4662_vm14, 0.0, %v2161_v8  ;;  %vm4699_vm1 = vcmp.eq.s32.totalorder %v1886_v55, 0  ;;  %v2128_v35 = vsel %vm591_vm0, %v2114_v36, %v2115_v6  ;;  %v2129_v53 = vsel %vm591_vm0, %v2121_v38, %v2114_v36 }
 0x170   : > { %v3584_v28 = vpack.i.bf16 %v2169_v0, %v2168_v15  ;;  %3580 = vrot.lane.b32.xlu0 %v3579_v59, %s3695_s21  ;;  %v2130_v55 = vsel %vm4693_vm15, 0.0, %v2129_v53  ;;  %v2131_v47 = vsel %vm4699_vm1, 0.0, %v2128_v35  ;;  %v2118_v10 = vrot.slane %v4545_v21, 7 }
 0x171   : > { %v2122_v6 = vsel %vm591_vm0, %v2120_v20, %v2121_v38  ;;  %v2123_v1 = vsel %vm591_vm0, %v2119_v46, %v2120_v20  ;;  %vm2226_vm2 = vcmask 261120   ;;  %vm2235_vm3 = vcmask 523264  }
 0x172   : > { %3585 = vrot.lane.b32.xlu1 %v3584_v28, %s3695_s21  ;;  %v2125_v36 = vsel %vm591_vm0, %v2117_v31, %v2118_v10  ;;  %v2124_v22 = vsel %vm591_vm0, %v2118_v10, %v2119_v46  ;;  %vm2290_vm12 = vcmask 785408   ;;  %v5197_v18 = vand.u32 7, %v5181_v13  ;;  %v3605_v10 = vld [vmem:[%s5089_s5] sm:$0xff]  }
 0x173   : > { %v5200_v26 = vmov %v5190_v62  ;;  %v5203_v42 = vand.u32 7, %v5173_v57  ;;  %v5204_v38 = vand.u32 7, %v5177_v63  ;;  %3051 = vmatpush1.bf16.msra.mxu1 %v3605_v10 }
 0x174   : > { %vm4740_vm13 = vcmp.eq.s32.totalorder %v5197_v18, 0  ;;  %vm4746_vm14 = vcmp.eq.s32.totalorder %v5200_v26, 0  ;;  %v2813_v26 = vand.u32 3, %v5151_v44 }
 0x175   : > { %vm1975_vm15 = vcmp.eq.s32.totalorder %v5203_v42, 0  ;;  %vm1976_vm1 = vcmp.eq.s32.totalorder %v5204_v38, 0  ;;  %v2136_v11 = vsel %vm4740_vm13, 0.0, %v2123_v1  ;;  %v2137_v7 = vsel %vm4746_vm14, 0.0, %v2122_v6  ;;  %v3606_v6 = vld [vmem:[%s5089_s5 + $0x8] sm:$0xff]  }
 0x176   : > { %v2135_v9 = vsel %vm1976_vm1, 0.0, %v2124_v22  ;;  %v5205_v1 = vmov 0   ;;  %v3608_v22 = vld [vmem:[%s5089_s5 + $0x18] sm:$0xff]   ;;  %vm2931_vm1 = vcmp.eq.s32.totalorder %v2813_v26, 3 }
 0x177   : > { %3052 = vmatprep.subr.bf16.mxu1 %v5205_v1 }
 0x178   : > { %3053 = vmatpush1.bf16.msra.mxu1 %v3606_v6 }
 0x179   : > { %3054 = vmatprep.subr.bf16.mxu1 %v5205_v1 }
 0x1ad   : > { %v3551_v45 = vpop.permute.xlu0 %3550 }
 0x1ae   : > { %v3553_v25 = vunpack.i.h.bf16 %v3551_v45  ;;  %v3552_v29 = vunpack.i.l.bf16 %v3551_v45  ;;  %v3609_v45 = vld [vmem:[%s5089_s5 + $0x20] sm:$0xff]  }
 0x1b0   : > { %v2227_v17 = vsel %vm2226_vm2, %v2130_v55, %v3552_v29  ;;  %v2228_v32 = vsel %vm2226_vm2, %v2131_v47, %v3553_v25  ;;  %v3610_v25 = vld [vmem:[%s5089_s5 + $0x28] sm:$0xff]   ;;  %v3611_v29 = vld [vmem:[%s5089_s5 + $0x30] sm:$0xff]  }
 0x1b5   : > { %v3556_v4 = vpop.permute.xlu1 %3555 }
 0x1b6   : > { %v3558_v60 = vunpack.i.h.bf16 %v3556_v4  ;;  %v3557_v48 = vunpack.i.l.bf16 %v3556_v4  ;;  %v3612_v4 = vld [vmem:[%s5089_s5 + $0x38] sm:$0xff]  }
 0x1b8   : > { %v2230_v40 = vsel %vm2226_vm2, %v2133_v54, %v3558_v60  ;;  %v2229_v61 = vsel %vm2226_vm2, %v2132_v34, %v3557_v48  ;;  %v2134_v54 = vsel %vm1975_vm15, 0.0, %v2125_v36  ;;  %v3607_v36 = vld [vmem:[%s5089_s5 + $0x10] sm:$0xff]   ;;  %v3614_v60 = vld [vmem:[%s5089_s5 + $0x48] sm:$0xff]  }
 0x1b9   : > { %3055 = vmatpush1.bf16.msra.mxu1 %v3607_v36 }
 0x1ba   : > { %v3561_v21 = vpop.permute.xlu0 %3560  ;;  %3056 = vmatprep.subr.bf16.mxu1 %v5205_v1 }
 0x1bb   : > { %v3563_v43 = vunpack.i.h.bf16 %v3561_v21  ;;  %v3562_v41 = vunpack.i.l.bf16 %v3561_v21  ;;  %v3613_v21 = vld [vmem:[%s5089_s5 + $0x40] sm:$0xff]  }
 0x1bd   : > { %v2236_v31 = vsel %vm2235_vm3, %v2227_v17, %v3562_v41  ;;  %v2237_v16 = vsel %vm2235_vm3, %v2228_v32, %v3563_v43  ;;  %3057 = vmatpush1.bf16.msra.mxu1 %v3608_v22  ;;  %v4806_v43 = vld [vmem:[%s5088_s4] ss:$0 sm:$0xff] }
 0x1be   : > { %v2244_v23 = vpack.c.bf16 %v2237_v16, %v2236_v31  ;;  %3058 = vmatprep.subr.bf16.mxu1 %v5205_v1 }
 0x1bf   : > { %v3571_v46 = vpop.permute.xlu1 %3570 }
 0x1c0   : > { %v3573_v3 = vunpack.i.h.bf16 %v3571_v46  ;;  %v3572_v30 = vunpack.i.l.bf16 %v3571_v46  ;;  %3474 = vmatprep.mubr.msk.bf16.mxu0 %vm2290_vm12, %v2244_v23 }
 0x1c1   : > { %3059 = vmatpush1.bf16.msra.mxu1 %v3609_v45 }
 0x1c2   : > { %v2238_v58 = vsel %vm2235_vm3, %v2229_v61, %v3572_v30  ;;  %v2239_v14 = vsel %vm2235_vm3, %v2230_v40, %v3573_v3  ;;  %3060 = vmatprep.subr.bf16.mxu1 %v5205_v1  ;;  %v3615_v40 = vld [vmem:[%s5089_s5 + $0x50] sm:$0xff]  }
 0x1c3   : > { %v2245_v12 = vpack.c.bf16 %v2239_v14, %v2238_v58 }
 0x1c5   : > { %3475 = vmatmul.mubr.msk.bf16.vlgmr.msra.gmra.mrb[0].mxu0 %vm2290_vm12, %v2245_v12  ;;  %3061 = vmatpush1.bf16.msra.mxu1 %v3610_v25  ;;  %v2806_v12 = vand.u32 3, %v3800_v2 }
 0x1c6   : > { %3062 = vmatprep.subr.bf16.mxu1 %v5205_v1 }
 0x1c7   : > { %vm4931_vm13 = vcmp.eq.s32.totalorder %v2806_v12, 0  ;;  %vm2930_vm15 = vcmp.eq.s32.totalorder %v2806_v12, 3 }
 0x1c9   : > { %3063 = vmatpush1.bf16.msra.mxu1 %v3611_v29 }
 0x1ca   : > { %3064 = vmatprep.subr.bf16.mxu1 %v5205_v1 }
 0x1cd   : > { %3065 = vmatpush1.bf16.msra.mxu1 %v3612_v4 }
 0x1ce   : > { %3066 = vmatprep.subr.bf16.mxu1 %v5205_v1 }
 0x1d1   : > { %3067 = vmatpush1.bf16.msra.mxu1 %v3613_v21 }
 0x1d2   : > { %3068 = vmatprep.subr.bf16.mxu1 %v5205_v1 }
 0x1d5   : > { %3069 = vmatpush1.bf16.msra.mxu1 %v3614_v60 }
 0x1d6   : > { %3070 = vmatprep.subr.bf16.mxu1 %v5205_v1 }
 0x1d9   : > { %3071 = vmatpush1.bf16.msra.mxu1 %v3615_v40 }
 0x1da   : > { %v3566_v19 = vpop.permute.xlu0 %3565  ;;  %3072 = vmatprep.subr.bf16.mxu1 %v5205_v1 }
 0x1db   : > { %v3568_v52 = vunpack.i.h.bf16 %v3566_v19  ;;  %v3567_v56 = vunpack.i.l.bf16 %v3566_v19 }
 0x1dd   : > { %v2231_v8 = vsel %vm2226_vm2, %v2134_v54, %v3567_v56  ;;  %v2232_v63 = vsel %vm2226_vm2, %v2135_v9, %v3568_v52 }
 0x1df   : > { %v3576_v39 = vpop.permute.xlu1 %3575 }
 0x1e0   : > { %v3578_v13 = vunpack.i.h.bf16 %v3576_v39  ;;  %v3577_v20 = vunpack.i.l.bf16 %v3576_v39 }
 0x1e2   : > { %v3581_v34 = vpop.permute.xlu0 %3580  ;;  %v2234_v0 = vsel %vm2226_vm2, %v2137_v7, %v3578_v13  ;;  %v2233_v33 = vsel %vm2226_vm2, %v2136_v11, %v3577_v20  ;;  %vm2552_vm2 = vcmask 517120  }
 0x1e3   : > { %v3583_v24 = vunpack.i.h.bf16 %v3581_v34  ;;  %v3582_v50 = vunpack.i.l.bf16 %v3581_v34 }
 0x1e4   : > { %v3586_v57 = vpop.permute.xlu1 %3585 }
 0x1e5   : > { %v3588_v59 = vunpack.i.h.bf16 %v3586_v57  ;;  %v3587_v15 = vunpack.i.l.bf16 %v3586_v57  ;;  %v2240_v28 = vsel %vm2235_vm3, %v2231_v8, %v3582_v50  ;;  %v2241_v37 = vsel %vm2235_vm3, %v2232_v63, %v3583_v24 }
 0x1e6   : > { %v2246_v35 = vpack.c.bf16 %v2241_v37, %v2240_v28 }
 0x1e7   : > { %v2242_v53 = vsel %vm2235_vm3, %v2233_v33, %v3587_v15  ;;  %v2243_v55 = vsel %vm2235_vm3, %v2234_v0, %v3588_v59 }
 0x1e8   : > { %v2247_v47 = vpack.c.bf16 %v2243_v55, %v2242_v53  ;;  %3478 = vmatprep.mubr.msk.bf16.mxu0 %vm2290_vm12, %v2246_v35 }
 0x1ea   : > { %3479 = vmatmul.mubr.msk.bf16.gmra.mrb[4].mxu0 %vm2290_vm12, %v2247_v47  ;;  %vm4922_vm12 = vcmp.eq.s32.totalorder %v2813_v26, 0 }
 0x298   : > { %v3476_v41 = vpop.f32.mrb[0].mxu0 }
 0x299   : > { %v2346_v48 = vadd.f32 %v3476_v41, %v4806_v43  ;;  %v2337_v17 = vpop.f32.mrb[1].mxu0 }
 0x29a   : > { %v2338_v32 = vadd.f32 %v4806_v43, %v2337_v17  ;;  %v3477_v31 = vpop.f32.mrb[2].mxu0 }
 0x29b   : > { %v2370_v16 = vmax.f32 %v2346_v48, 0.0  ;;  %v2349_v46 = vadd.f32 %v3477_v31, %v4806_v43  ;;  %v2340_v23 = vpop.f32.mrb[3].mxu0 }
 0x29c   : > { %v2368_v3 = vmax.f32 %v2338_v32, 0.0  ;;  %v2341_v30 = vadd.f32 %v4806_v43, %v2340_v23 }
 0x29d   : > { %v2418_v61 = vcombine.high %v2370_v16, %v2370_v16  ;;  %v2425_v58 = vrot.slane %v2370_v16, %v4098_v5  ;;  %v4820_v14 = vmax.f32 %v2349_v46, 0.0 }
 0x29e   : > { %v2384_v19 = vcombine.high %v2368_v3, %v2368_v3  ;;  %v2391_v18 = vrot.slane %v2368_v3, %v4098_v5  ;;  %v4825_v49 = vmax.f32 %v2341_v30, 0.0 }
 0x29f   : > { %v2432_v62 = vrot.slane %v2418_v61, %v4098_v5  ;;  %v2433_v39 = vcombine.high %v2425_v58, %v2425_v58  ;;  %v2609_v42 = vsel %vm2552_vm2, %v2425_v58, -inf  ;;  %v2435_v38 = vcombine.high %v4820_v14, %v4820_v14 }
 0x2a0   : > { %v2610_v52 = vrot.slane %v2609_v42, 4  ;;  %v2398_v56 = vrot.slane %v2384_v19, %v4098_v5  ;;  %v2399_v13 = vcombine.high %v2391_v18, %v2391_v18  ;;  %v2553_v20 = vsel %vm2552_vm2, %v2391_v18, -inf }
 0x2a1   : > { %v2434_v11 = vcombine.high %v2432_v62, %v2432_v62  ;;  %v2616_v7 = vsel %vm2552_vm2, %v2433_v39, -inf  ;;  %v2623_v34 = vsel %vm2552_vm2, %v2432_v62, -inf  ;;  %v2554_v54 = vrot.slane %v2553_v20, 4 }
 0x2a2   : > { %v2611_v9 = vmax.f32 %v2609_v42, %v2610_v52  ;;  %v2617_v24 = vrot.slane %v2616_v7, 4  ;;  %v2624_v50 = vrot.slane %v2623_v34, 4  ;;  %v2400_v57 = vcombine.high %v2398_v56, %v2398_v56 }
 0x2a3   : > { %v2630_v8 = vsel %vm2552_vm2, %v2434_v11, -inf  ;;  %v2555_v63 = vmax.f32 %v2553_v20, %v2554_v54  ;;  %v2560_v59 = vsel %vm2552_vm2, %v2399_v13, -inf  ;;  %v2567_v15 = vsel %vm2552_vm2, %v2398_v56, -inf }
 0x2a4   : > { %v2612_v0 = vrot.slane %v2611_v9, 2  ;;  %v2618_v33 = vmax.f32 %v2616_v7, %v2617_v24  ;;  %v2625_v28 = vmax.f32 %v2623_v34, %v2624_v50  ;;  %v2631_v37 = vrot.slane %v2630_v8, 4 }
 0x2a5   : > { %v2556_v35 = vrot.slane %v2555_v63, 2  ;;  %v2561_v53 = vrot.slane %v2560_v59, 4  ;;  %v2568_v55 = vrot.slane %v2567_v15, 4  ;;  %v2574_v47 = vsel %vm2552_vm2, %v2400_v57, -inf }
 0x2a6   : > { %v2613_v10 = vmax.f32 %v2611_v9, %v2612_v0  ;;  %v2619_v6 = vrot.slane %v2618_v33, 2  ;;  %v2626_v1 = vrot.slane %v2625_v28, 2  ;;  %v2632_v36 = vmax.f32 %v2630_v8, %v2631_v37 }
 0x2a7   : > { %v2557_v22 = vmax.f32 %v2555_v63, %v2556_v35  ;;  %v2562_v45 = vmax.f32 %v2560_v59, %v2561_v53  ;;  %v2569_v25 = vmax.f32 %v2567_v15, %v2568_v55  ;;  %v2575_v29 = vrot.slane %v2574_v47, 4 }
 0x2a8   : > { %v2614_v4 = vrot.slane %v2613_v10, 1  ;;  %v2620_v21 = vmax.f32 %v2618_v33, %v2619_v6  ;;  %v2627_v41 = vmax.f32 %v2625_v28, %v2626_v1  ;;  %v2633_v60 = vrot.slane %v2632_v36, 2 }
 0x2a9   : > { %v2558_v48 = vrot.slane %v2557_v22, 1  ;;  %v2563_v17 = vrot.slane %v2562_v45, 2  ;;  %v2570_v32 = vrot.slane %v2569_v25, 2  ;;  %v2576_v31 = vmax.f32 %v2574_v47, %v2575_v29 }
 0x2aa   : > { %v2615_v16 = vmax.f32 %v2613_v10, %v2614_v4  ;;  %v2621_v46 = vrot.slane %v2620_v21, 1  ;;  %v2628_v23 = vrot.slane %v2627_v41, 1  ;;  %v2634_v3 = vmax.f32 %v2632_v36, %v2633_v60 }
 0x2ab   : > { %v2559_v30 = vmax.f32 %v2557_v22, %v2558_v48  ;;  %v2564_v40 = vmax.f32 %v2562_v45, %v2563_v17  ;;  %v2571_v61 = vmax.f32 %v2569_v25, %v2570_v32  ;;  %v2577_v58 = vrot.slane %v2576_v31, 2 }
 0x2ac   : > { %v2622_v19 = vmax.f32 %v2620_v21, %v2621_v46  ;;  %v2629_v18 = vmax.f32 %v2627_v41, %v2628_v23  ;;  %v2635_v62 = vrot.slane %v2634_v3, 1  ;;  %v2442_v39 = vrot.slane %v4820_v14, %v4098_v5 }
 0x2ad   : > { %v2565_v42 = vrot.slane %v2564_v40, 1  ;;  %v2572_v52 = vrot.slane %v2571_v61, 1  ;;  %v2578_v56 = vmax.f32 %v2576_v31, %v2577_v58  ;;  %v2449_v13 = vrot.slane %v2435_v38, %v4098_v5 }
 0x2ae   : > { %v2636_v20 = vmax.f32 %v2634_v3, %v2635_v62  ;;  %v2893_v11 = vsel %vm2043_vm4, %v2622_v19, %v2615_v16  ;;  %v2450_v7 = vcombine.high %v2442_v39, %v2442_v39  ;;  %v2637_v34 = vsel %vm2552_vm2, %v2442_v39, -inf }
 0x2af   : > { %v2894_v54 = vsel %vm2045_vm5, %v2629_v18, %v2893_v11  ;;  %v2566_v9 = vmax.f32 %v2564_v40, %v2565_v42  ;;  %v2573_v24 = vmax.f32 %v2571_v61, %v2572_v52  ;;  %v2579_v50 = vrot.slane %v2578_v56, 1 }
 0x2b0   : > { %v2451_v57 = vcombine.high %v2449_v13, %v2449_v13  ;;  %v2638_v8 = vrot.slane %v2637_v34, 4  ;;  %v2644_v14 = vsel %vm2552_vm2, %v2450_v7, -inf  ;;  %v2651_v63 = vsel %vm2552_vm2, %v2449_v13, -inf }
 0x2b1   : > { %v2580_v59 = vmax.f32 %v2578_v56, %v2579_v50  ;;  %v2886_v38 = vsel %vm2043_vm4, %v2566_v9, %v2559_v30  ;;  %v2645_v15 = vrot.slane %v2644_v14, 4  ;;  %v2652_v0 = vrot.slane %v2651_v63, 4 }
 0x2b2   : > { %v2887_v33 = vsel %vm2045_vm5, %v2573_v24, %v2886_v38  ;;  %v2639_v28 = vmax.f32 %v2637_v34, %v2638_v8  ;;  %v2658_v37 = vsel %vm2552_vm2, %v2451_v57, -inf  ;;  %v2401_v35 = vcombine.high %v4825_v49, %v4825_v49 }
 0x2b3   : > { %v2646_v53 = vmax.f32 %v2644_v14, %v2645_v15  ;;  %v2653_v55 = vmax.f32 %v2651_v63, %v2652_v0  ;;  %v2659_v47 = vrot.slane %v2658_v37, 4  ;;  %v2408_v10 = vrot.slane %v4825_v49, %v4098_v5  ;;  %v3616_v0 = vld [vmem:[%s5089_s5 + $0x58] sm:$0xff]  }
 0x2b4   : > { %v2640_v6 = vrot.slane %v2639_v28, 2  ;;  %v2415_v1 = vrot.slane %v2401_v35, %v4098_v5  ;;  %v4858_v36 = vsel %vm2047_vm7, %v2580_v59, %v2887_v33  ;;  %v2895_v22 = vsel %vm2047_vm7, %v2636_v20, %v2894_v54  ;;  %3073 = vmatpush1.bf16.msra.mxu1 %v3616_v0 }
 0x2b5   : > { %v2647_v45 = vrot.slane %v2646_v53, 2  ;;  %v2654_v25 = vrot.slane %v2653_v55, 2  ;;  %v2660_v29 = vmax.f32 %v2658_v37, %v2659_v47  ;;  %v2416_v4 = vcombine.high %v2408_v10, %v2408_v10 }
 0x2b6   : > { %v2641_v21 = vmax.f32 %v2639_v28, %v2640_v6  ;;  %v2417_v41 = vcombine.high %v2415_v1, %v2415_v1  ;;  %v2581_v60 = vsel %vm2552_vm2, %v2408_v10, -inf  ;;  %v2595_v48 = vsel %vm2552_vm2, %v2415_v1, -inf }
 0x2b7   : > { %v2648_v17 = vmax.f32 %v2646_v53, %v2647_v45  ;;  %v2655_v49 = vmax.f32 %v2653_v55, %v2654_v25  ;;  %v2661_v32 = vrot.slane %v2660_v29, 2  ;;  %v2582_v31 = vrot.slane %v2581_v60, 4 }
 0x2b8   : > { %v2642_v16 = vrot.slane %v2641_v21, 1  ;;  %v2588_v46 = vsel %vm2552_vm2, %v2416_v4, -inf  ;;  %v2596_v23 = vrot.slane %v2595_v48, 4  ;;  %v2602_v3 = vsel %vm2552_vm2, %v2417_v41, -inf }
 0x2b9   : > { %v2649_v30 = vrot.slane %v2648_v17, 1  ;;  %v2656_v40 = vrot.slane %v2655_v49, 1  ;;  %v2662_v61 = vmax.f32 %v2660_v29, %v2661_v32  ;;  %v2583_v58 = vmax.f32 %v2581_v60, %v2582_v31 }
 0x2ba   : > { %v2643_v19 = vmax.f32 %v2641_v21, %v2642_v16  ;;  %v2589_v18 = vrot.slane %v2588_v46, 4  ;;  %v2597_v62 = vmax.f32 %v2595_v48, %v2596_v23  ;;  %v2603_v39 = vrot.slane %v2602_v3, 4 }
 0x2bb   : > { %v2650_v42 = vmax.f32 %v2648_v17, %v2649_v30  ;;  %v2657_v52 = vmax.f32 %v2655_v49, %v2656_v40  ;;  %v2584_v56 = vrot.slane %v2583_v58, 2  ;;  %v2663_v13 = vrot.slane %v2662_v61, 1 }
 0x2bc   : > { %v2590_v20 = vmax.f32 %v2588_v46, %v2589_v18  ;;  %v2598_v11 = vrot.slane %v2597_v62, 2  ;;  %v2604_v7 = vmax.f32 %v2602_v3, %v2603_v39  ;;  %v2896_v34 = vsel %vm2049_vm8, %v2643_v19, %v2895_v22 }
 0x2bd   : > { %v3480_v54 = vpop.f32.mrb[4].mxu0  ;;  %v2585_v9 = vmax.f32 %v2583_v58, %v2584_v56  ;;  %v2664_v24 = vmax.f32 %v2662_v61, %v2663_v13  ;;  %v2897_v50 = vsel %vm2051_vm9, %v2650_v42, %v2896_v34 }
 0x2be   : > { %v2362_v57 = vadd.f32 %v3480_v54, %v4806_v43  ;;  %v2353_v8 = vpop.f32.mrb[5].mxu0  ;;  %v2591_v14 = vrot.slane %v2590_v20, 2  ;;  %v2599_v63 = vmax.f32 %v2597_v62, %v2598_v11  ;;  %v2605_v59 = vrot.slane %v2604_v7, 2 }
 0x2bf   : > { %v2898_v38 = vsel %vm2053_vm10, %v2657_v52, %v2897_v50  ;;  %v3481_v15 = vpop.f32.mrb[6].mxu0  ;;  %v2586_v33 = vrot.slane %v2585_v9, 1  ;;  %v2354_v35 = vadd.f32 %v4806_v43, %v2353_v8 }
 0x2c0   : > { %v4873_v28 = vsel %vm2055_vm11, %v2664_v24, %v2898_v38  ;;  %v2374_v37 = vmax.f32 %v2362_v57, 0.0  ;;  %v4876_v53 = vpop.f32.mrb[7].mxu0  ;;  %v2592_v55 = vmax.f32 %v2590_v20, %v2591_v14  ;;  %v2600_v47 = vrot.slane %v2599_v63, 1 }
 0x2c1   : > { %v2606_v10 = vmax.f32 %v2604_v7, %v2605_v59  ;;  %v2919_v6 = vrot.slane %v4873_v28, 7  ;;  %v2587_v1 = vmax.f32 %v2585_v9, %v2586_v33  ;;  %v2372_v25 = vmax.f32 %v2354_v35, 0.0 }
 0x2c2   : > { %v2486_v22 = vcombine.high %v2374_v37, %v2374_v37  ;;  %v2493_v45 = vrot.slane %v2374_v37, %v4098_v5  ;;  %v2593_v29 = vrot.slane %v2592_v55, 1  ;;  %v2601_v4 = vmax.f32 %v2599_v63, %v2600_v47 }
 0x2c3   : > { %v2607_v21 = vrot.slane %v2606_v10, 1  ;;  %v2365_v41 = vadd.f32 %v3481_v15, %v4806_v43  ;;  %v2889_v60 = vsel %vm2049_vm8, %v2587_v1, %v4858_v36  ;;  %v2452_v46 = vcombine.high %v2372_v25, %v2372_v25 }
 0x2c4   : > { %v2500_v48 = vrot.slane %v2486_v22, %v4098_v5  ;;  %v2501_v17 = vcombine.high %v2493_v45, %v2493_v45  ;;  %v2721_v49 = vsel %vm2552_vm2, %v2493_v45, -inf  ;;  %v2594_v32 = vmax.f32 %v2592_v55, %v2593_v29 }
 0x2c5   : > { %v2608_v31 = vmax.f32 %v2606_v10, %v2607_v21  ;;  %v2722_v16 = vrot.slane %v2721_v49, 4  ;;  %v2459_v40 = vrot.slane %v2372_v25, %v4098_v5  ;;  %v2466_v39 = vrot.slane %v2452_v46, %v4098_v5 }
 0x2c6   : > { %v2502_v23 = vcombine.high %v2500_v48, %v2500_v48  ;;  %v2728_v3 = vsel %vm2552_vm2, %v2501_v17, -inf  ;;  %v2735_v30 = vsel %vm2552_vm2, %v2500_v48, -inf  ;;  %v2890_v61 = vsel %vm2051_vm9, %v2594_v32, %v2889_v60 }
 0x2c7   : > { %v2723_v58 = vmax.f32 %v2721_v49, %v2722_v16  ;;  %v2729_v36 = vrot.slane %v2728_v3, 4  ;;  %v2736_v19 = vrot.slane %v2735_v30, 4  ;;  %v2891_v18 = vsel %vm2053_vm10, %v2601_v4, %v2890_v61 }
 0x2c8   : > { %v2742_v62 = vsel %vm2552_vm2, %v2502_v23, -inf  ;;  %v2467_v42 = vcombine.high %v2459_v40, %v2459_v40  ;;  %v4893_v52 = vsel %vm2055_vm11, %v2608_v31, %v2891_v18  ;;  %v2468_v54 = vcombine.high %v2466_v39, %v2466_v39 }
 0x2c9   : > { %v2724_v56 = vrot.slane %v2723_v58, 2  ;;  %v2730_v13 = vmax.f32 %v2728_v3, %v2729_v36  ;;  %v2737_v20 = vmax.f32 %v2735_v30, %v2736_v19  ;;  %v3589_v11 = vpack.i.bf16 %v4873_v28, %v4893_v52 }
 0x2ca   : > { %v2918_v7 = vrot.slane %v4893_v52, 7  ;;  %v2743_v34 = vrot.slane %v2742_v62, 4  ;;  %v2665_v57 = vsel %vm2552_vm2, %v2459_v40, -inf  ;;  %v2672_v63 = vsel %vm2552_vm2, %v2467_v42, -inf }
 0x2cb   : > { %v2725_v9 = vmax.f32 %v2723_v58, %v2724_v56  ;;  %v2731_v24 = vrot.slane %v2730_v13, 2  ;;  %v2738_v50 = vrot.slane %v2737_v20, 2  ;;  %3590 = vrot.lane.b32.xlu0 %v3589_v11, %s3695_s21  ;;  %v2666_v14 = vrot.slane %v2665_v57, 4 }
 0x2cc   : > { %v2744_v8 = vmax.f32 %v2742_v62, %v2743_v34  ;;  %v2679_v59 = vsel %vm2552_vm2, %v2466_v39, -inf  ;;  %v2673_v33 = vrot.slane %v2672_v63, 4  ;;  %v2686_v47 = vsel %vm2552_vm2, %v2468_v54, -inf }
 0x2cd   : > { %v2726_v38 = vrot.slane %v2725_v9, 1  ;;  %v2732_v15 = vmax.f32 %v2730_v13, %v2731_v24  ;;  %v2739_v0 = vmax.f32 %v2737_v20, %v2738_v50  ;;  %v2667_v35 = vmax.f32 %v2665_v57, %v2666_v14 }
 0x2ce   : > { %v2745_v37 = vrot.slane %v2744_v8, 2  ;;  %v2680_v55 = vrot.slane %v2679_v59, 4  ;;  %v2674_v45 = vmax.f32 %v2672_v63, %v2673_v33  ;;  %v2687_v21 = vrot.slane %v2686_v47, 4 }
 0x2cf   : > { %v2727_v10 = vmax.f32 %v2725_v9, %v2726_v38  ;;  %v2733_v1 = vrot.slane %v2732_v15, 1  ;;  %v2740_v22 = vrot.slane %v2739_v0, 1  ;;  %v2668_v29 = vrot.slane %v2667_v35, 2 }
 0x2d0   : > { %v2746_v25 = vmax.f32 %v2744_v8, %v2745_v37  ;;  %v2681_v4 = vmax.f32 %v2679_v59, %v2680_v55  ;;  %v2675_v17 = vrot.slane %v2674_v45, 2  ;;  %v2375_v49 = vmax.f32 %v2365_v41, 0.0 }
 0x2d1   : > { %v2734_v60 = vmax.f32 %v2732_v15, %v2733_v1  ;;  %v2741_v48 = vmax.f32 %v2739_v0, %v2740_v22  ;;  %v2669_v31 = vmax.f32 %v2667_v35, %v2668_v29  ;;  %v2688_v46 = vmax.f32 %v2686_v47, %v2687_v21 }
 0x2d2   : > { %v2747_v32 = vrot.slane %v2746_v25, 1  ;;  %v2682_v16 = vrot.slane %v2681_v4, 2  ;;  %v2676_v3 = vmax.f32 %v2674_v45, %v2675_v17  ;;  %v2503_v30 = vcombine.high %v2375_v49, %v2375_v49 }
 0x2d3   : > { %v2907_v23 = vsel %vm2043_vm4, %v2734_v60, %v2727_v10  ;;  %v2510_v40 = vrot.slane %v2375_v49, %v4098_v5  ;;  %v2670_v36 = vrot.slane %v2669_v31, 1  ;;  %v2689_v62 = vrot.slane %v2688_v46, 2 }
 0x2d4   : > { %v2748_v61 = vmax.f32 %v2746_v25, %v2747_v32  ;;  %v2908_v58 = vsel %vm2045_vm5, %v2741_v48, %v2907_v23  ;;  %v2683_v19 = vmax.f32 %v2681_v4, %v2682_v16  ;;  %v2677_v18 = vrot.slane %v2676_v3, 1 }
 0x2d5   : > { %v2517_v39 = vrot.slane %v2503_v30, %v4098_v5  ;;  %v2518_v41 = vcombine.high %v2510_v40, %v2510_v40  ;;  %v2671_v42 = vmax.f32 %v2669_v31, %v2670_v36  ;;  %v2749_v13 = vsel %vm2552_vm2, %v2510_v40, -inf }
 0x2d6   : > { %v2684_v56 = vrot.slane %v2683_v19, 1  ;;  %v2357_v20 = vadd.f32 %v4806_v43, %v4876_v53  ;;  %v2678_v11 = vmax.f32 %v2676_v3, %v2677_v18  ;;  %v2690_v34 = vmax.f32 %v2688_v46, %v2689_v62 }
 0x2d7   : > { %v2519_v54 = vcombine.high %v2517_v39, %v2517_v39  ;;  %v2750_v9 = vrot.slane %v2749_v13, 4  ;;  %v2756_v50 = vsel %vm2552_vm2, %v2518_v41, -inf  ;;  %v2763_v57 = vsel %vm2552_vm2, %v2517_v39, -inf }
 0x2d8   : > { %v2685_v24 = vmax.f32 %v2683_v19, %v2684_v56  ;;  %v2373_v8 = vmax.f32 %v2357_v20, 0.0  ;;  %v2691_v14 = vrot.slane %v2690_v34, 1  ;;  %v2900_v63 = vsel %vm2043_vm4, %v2678_v11, %v2671_v42 }
 0x2d9   : > { %v2751_v59 = vmax.f32 %v2749_v13, %v2750_v9  ;;  %v2757_v38 = vrot.slane %v2756_v50, 4  ;;  %v2764_v0 = vrot.slane %v2763_v57, 4  ;;  %v2770_v43 = vsel %vm2552_vm2, %v2519_v54, -inf }
 0x2da   : > { %v2901_v15 = vsel %vm2045_vm5, %v2685_v24, %v2900_v63  ;;  %v2469_v53 = vcombine.high %v2373_v8, %v2373_v8  ;;  %v2692_v33 = vmax.f32 %v2690_v34, %v2691_v14  ;;  %v2771_v55 = vrot.slane %v2770_v43, 4 }
 0x2db   : > { %v2752_v37 = vrot.slane %v2751_v59, 2  ;;  %v2758_v35 = vmax.f32 %v2756_v50, %v2757_v38  ;;  %v2765_v47 = vmax.f32 %v2763_v57, %v2764_v0  ;;  %v2476_v10 = vrot.slane %v2373_v8, %v4098_v5 }
 0x2dc   : > { %v2483_v1 = vrot.slane %v2469_v53, %v4098_v5  ;;  %v2909_v22 = vsel %vm2047_vm7, %v2748_v61, %v2908_v58  ;;  %v2772_v29 = vmax.f32 %v2770_v43, %v2771_v55  ;;  %v2902_v4 = vsel %vm2047_vm7, %v2692_v33, %v2901_v15 }
 0x2dd   : > { %v2753_v45 = vmax.f32 %v2751_v59, %v2752_v37  ;;  %v2759_v25 = vrot.slane %v2758_v35, 2  ;;  %v2766_v21 = vrot.slane %v2765_v47, 2  ;;  %v2484_v60 = vcombine.high %v2476_v10, %v2476_v10 }
 0x2de   : > { %v2485_v48 = vcombine.high %v2483_v1, %v2483_v1  ;;  %v2693_v17 = vsel %vm2552_vm2, %v2476_v10, -inf  ;;  %v2773_v31 = vrot.slane %v2772_v29, 2  ;;  %v2707_v3 = vsel %vm2552_vm2, %v2483_v1, -inf }
 0x2df   : > { %v2754_v32 = vrot.slane %v2753_v45, 1  ;;  %v2760_v5 = vmax.f32 %v2758_v35, %v2759_v25  ;;  %v2694_v16 = vrot.slane %v2693_v17, 4  ;;  %v2767_v46 = vmax.f32 %v2765_v47, %v2766_v21 }
 0x2e0   : > { %v2700_v23 = vsel %vm2552_vm2, %v2484_v60, -inf  ;;  %v2714_v30 = vsel %vm2552_vm2, %v2485_v48, -inf  ;;  %v2774_v58 = vmax.f32 %v2772_v29, %v2773_v31  ;;  %v2708_v39 = vrot.slane %v2707_v3, 4 }
 0x2e1   : > { %v2755_v40 = vmax.f32 %v2753_v45, %v2754_v32  ;;  %v2761_v61 = vrot.slane %v2760_v5, 1  ;;  %v2695_v36 = vmax.f32 %v2693_v17, %v2694_v16  ;;  %v2768_v18 = vrot.slane %v2767_v46, 1 }
 0x2e2   : > { %v2701_v62 = vrot.slane %v2700_v23, 4  ;;  %v2715_v41 = vrot.slane %v2714_v30, 4  ;;  %v2775_v13 = vrot.slane %v2774_v58, 1  ;;  %v2709_v54 = vmax.f32 %v2707_v3, %v2708_v39 }
 0x2e3   : > { %v2762_v42 = vmax.f32 %v2760_v5, %v2761_v61  ;;  %v2696_v56 = vrot.slane %v2695_v36, 2  ;;  %v2910_v20 = vsel %vm2049_vm8, %v2755_v40, %v2909_v22  ;;  %v2769_v11 = vmax.f32 %v2767_v46, %v2768_v18 }
 0x2e4   : > { %v2702_v34 = vmax.f32 %v2700_v23, %v2701_v62  ;;  %v2716_v9 = vmax.f32 %v2714_v30, %v2715_v41  ;;  %v2776_v50 = vmax.f32 %v2774_v58, %v2775_v13  ;;  %v2934_v8 = vrot.slane %v4893_v52, 1 }
 0x2e5   : > { %v2697_v24 = vmax.f32 %v2695_v36, %v2696_v56  ;;  %v2911_v57 = vsel %vm2051_vm9, %v2762_v42, %v2910_v20  ;;  %v2710_v63 = vrot.slane %v2709_v54, 2  ;;  %v2935_v43 = vrot.slane %v4873_v28, 1 }
 0x2e6   : > { %v2703_v14 = vrot.slane %v2702_v34, 2  ;;  %v2717_v59 = vrot.slane %v2716_v9, 2  ;;  %v2912_v38 = vsel %vm2053_vm10, %v2769_v11, %v2911_v57  ;;  %v2924_v53 = vsel %vm591_vm0, %v2918_v7, %v2919_v6  ;;  %v3619_v57 = vld [vmem:[%s5091_s7 + $0x10] sm:$0xff]  }
 0x2e7   : > { %v2698_v15 = vrot.slane %v2697_v24, 1  ;;  %v2913_v0 = vsel %vm2055_vm11, %v2776_v50, %v2912_v38  ;;  %v2711_v37 = vmax.f32 %v2709_v54, %v2710_v63  ;;  %v2940_v1 = vsel %vm656_vm6, %v2934_v8, %v2935_v43  ;;  %v3618_v50 = vld [vmem:[%s5091_s7 + $0x8] sm:$0xff]   ;;  %v3624_v38 = vld [vmem:[%s5091_s7 + $0x38] sm:$0xff]  }
 0x2e8   : > { %v2704_v33 = vmax.f32 %v2702_v34, %v2703_v14  ;;  %v2718_v35 = vmax.f32 %v2716_v9, %v2717_v59  ;;  %v2921_v55 = vrot.slane %v2913_v0, 7  ;;  %v2937_v10 = vrot.slane %v2913_v0, 1  ;;  %v3617_v9 = vld [vmem:[%s5091_s7] sm:$0xff]   ;;  %v3622_v63 = vld [vmem:[%s5091_s7 + $0x28] sm:$0xff]   ;;  %v3623_v59 = vld [vmem:[%s5091_s7 + $0x30] sm:$0xff]  }
 0x2e9   : > { %v2699_v47 = vmax.f32 %v2697_v24, %v2698_v15  ;;  %v2927_v22 = vsel %vm4922_vm12, 0.0, %v2924_v53  ;;  %v2712_v25 = vrot.slane %v2711_v37, 1  ;;  %v2827_v48 = vand.u32 3, %v5165_v51  ;;  %v3621_v14 = vld [vmem:[%s5091_s7 + $0x20] sm:$0xff]  }
 0x2ea   : > { %v2705_v45 = vrot.slane %v2704_v33, 1  ;;  %v2719_v29 = vrot.slane %v2718_v35, 1  ;;  %v2925_v60 = vsel %vm591_vm0, %v2921_v55, %v2918_v7  ;;  %v2941_v17 = vsel %vm656_vm6, %v2937_v10, %v2934_v8  ;;  %v3620_v8 = vld [vmem:[%s5091_s7 + $0x18] sm:$0xff]   ;;  %v3415_v15 = vld [vmem:[%s5090_s6] ss:$0 sm:$0xff] }
 0x2eb   : > { %v2903_v21 = vsel %vm2049_vm8, %v2699_v47, %v2902_v4  ;;  %v2926_v49 = vsel %vm4931_vm13, 0.0, %v2925_v60  ;;  %v2713_v5 = vmax.f32 %v2711_v37, %v2712_v25  ;;  %v2820_v31 = vand.u32 3, %v5164_v27 }
 0x2ec   : > { %v2706_v32 = vmax.f32 %v2704_v33, %v2705_v45  ;;  %v2720_v16 = vmax.f32 %v2718_v35, %v2719_v29  ;;  %vm4964_vm14 = vcmp.eq.s32.totalorder %v2827_v48, 3  ;;  %v2942_v26 = vsel %vm2930_vm15, 0.0, %v2940_v1 }
 0x2ed   : > { %vm2932_vm2 = vcmp.eq.s32.totalorder %v2820_v31, 3  ;;  %v2945_v3 = vsel %vm4964_vm14, 0.0, %v2941_v17  ;;  %v3696_v24 = vmov 0.0   ;;  %vm3697_vm12 = vmmov 0  }
 0x2ee   : > { %v2904_v4 = vsel %vm2051_vm9, %v2706_v32, %v2903_v21  ;;  %3482 = vmatprep.subr.bf16.mxu0 %v3696_v24  ;;  %3498 = vmatprep.mubr.msk.bf16.mxu0 %vm3697_vm12, %v3696_v24 }
 0x2ef   : > { %v2905_v52 = vsel %vm2053_vm10, %v2713_v5, %v2904_v4  ;;  %3483 = vmatpush3.bf16.msra.mxu0 %v3617_v9 }
 0x2f0   : > { %v2906_v51 = vsel %vm2055_vm11, %v2720_v16, %v2905_v52  ;;  %3484 = vmatprep.subr.bf16.mxu0 %v3696_v24 }
 0x2f1   : > { %v3594_v7 = vpack.i.bf16 %v2913_v0, %v2906_v51  ;;  %v2920_v23 = vrot.slane %v2906_v51, 7  ;;  %v2936_v27 = vrot.slane %v2906_v51, 1 }
 0x2f3   : > { %3595 = vrot.lane.b32.xlu1 %v3594_v7, %s3695_s21  ;;  %v2939_v30 = vsel %vm656_vm6, %v2935_v43, %v2936_v27  ;;  %v2938_v40 = vsel %vm656_vm6, %v2936_v27, %v2937_v10  ;;  %v2922_v12 = vsel %vm591_vm0, %v2920_v23, %v2921_v55  ;;  %v2923_v44 = vsel %vm591_vm0, %v2919_v6, %v2920_v23  ;;  %s3337_s21 = sshll.u32 %s326_s25, 4  ;;  %s5044_s21 = int_to_ptr.vmem [resolvable:$true] %s3337_s21 }
 0x2f4   : > { %v2943_v61 = vsel %vm2931_vm1, 0.0, %v2939_v30  ;;  %v2944_v58 = vsel %vm2932_vm2, 0.0, %v2938_v40  ;;  %vm2852_vm6 = vcmp.eq.s32.totalorder %v2820_v31, 0  ;;  %vm2853_vm0 = vcmp.eq.s32.totalorder %v2827_v48, 0  ;;  %3485 = vmatpush3.bf16.msra.mxu0 %v3618_v50  ;;  %s3628_s14 = scalar_lea.vmem %s5044_s21, 128  ;;  %p3635_p0 = scmp.lt.s32.totalorder %s5044_s21, %s3633_s16 }
 0x2f5   : > { %v2963_v36 = vpack.c.bf16 %v2943_v61, %v2942_v26  ;;  %v2965_v19 = vpack.c.bf16 %v2945_v3, %v2944_v58  ;;  %v2928_v13 = vsel %vm2852_vm6, 0.0, %v2923_v44  ;;  %v2929_v20 = vsel %vm2853_vm0, 0.0, %v2922_v12  ;;  %3486 = vmatprep.subr.bf16.mxu0 %v3696_v24  ;;  %p3629_p11 = scmp.ne.s32.totalorder %s5044_s21, %s3628_s14  ;;  %p3636_p1 = scmp.lt.s32.totalorder %s3634_s17, %s3628_s14 }
 0x2f7   : > { %3428 = vmatprep.mubr.msk.bf16.mxu1 %vm2235_vm3, %v2963_v36  ;;  %p3630_p12 = pnand %p3629_p11, %p3787_p5  ;;  %p3637_p2 = por %p3636_p1, %p3635_p0 }
 0x2f8   : > { %3487 = vmatpush3.bf16.msra.mxu0 %v3619_v57 }
 0x2f9   : > { %3488 = vmatprep.subr.bf16.mxu0 %v3696_v24  ;;  %p3631_p13 = pneg %p3630_p12 }
 0x2fb   : > { %p3638_p3 = pnand %p3637_p2, %p3631_p13 }
 0x2fc   : > { %3489 = vmatpush3.bf16.msra.mxu0 %v3620_v8 }
 0x2fd   : > { %3490 = vmatprep.subr.bf16.mxu0 %v3696_v24 }
 0x300   : > { %3491 = vmatpush3.bf16.msra.mxu0 %v3621_v14 }
 0x301   : > { %3492 = vmatprep.subr.bf16.mxu0 %v3696_v24 }
 0x304   : > { %3493 = vmatpush3.bf16.msra.mxu0 %v3622_v63 }
 0x305   : > { %3494 = vmatprep.subr.bf16.mxu0 %v3696_v24 }
 0x308   : > { %3495 = vmatpush3.bf16.msra.mxu0 %v3623_v59 }
 0x309   : > { %3496 = vmatprep.subr.bf16.mxu0 %v3696_v24 }
 0x30c   : > { %3497 = vmatpush3.bf16.msra.mxu0 %v3624_v38 }
 0x33d   : > { %v3591_v18 = vpop.permute.xlu0 %3590 }
 0x33e   : > { %v3593_v62 = vunpack.i.h.bf16 %v3591_v18  ;;  %v3592_v39 = vunpack.i.l.bf16 %v3591_v18 }
 0x340   : > { %v2958_v41 = vsel %vm2235_vm3, %v2926_v49, %v3592_v39  ;;  %v2959_v42 = vsel %vm2235_vm3, %v2927_v22, %v3593_v62 }
 0x341   : > { %v2962_v56 = vpack.c.bf16 %v2959_v42, %v2958_v41 }
 0x343   : > { %3083 = vmatmul.mubr.bf16.vlgmr.msra.gmra.mrb[0].mxu1 %v2962_v56 }
 0x344   : > { %3429 = vmatprep.mubr.msk.bf16.mxu1 %vm2235_vm3, %v2965_v19 }
 0x365   : > { %v3596_v2 = vpop.permute.xlu1 %3595 }
 0x366   : > { %v3598_v28 = vunpack.i.h.bf16 %v3596_v2  ;;  %v3597_v6 = vunpack.i.l.bf16 %v3596_v2 }
 0x368   : > { %v2960_v11 = vsel %vm2235_vm3, %v2928_v13, %v3597_v6  ;;  %v2961_v34 = vsel %vm2235_vm3, %v2929_v20, %v3598_v28  ;;  %vm3115_vm3 = vcmask 1043456  }
 0x369   : > { %v2964_v54 = vpack.c.bf16 %v2961_v34, %v2960_v11 }
 0x36b   : > { %3091 = vmatmul.mubr.bf16.gmra.mrb[4].mxu1 %v2964_v54 }
 0x416   : > { %v3084_v0 = vpop.f32.mrb[0].mxu1 }
 0x417   : > { %v3085_v43 = vadd.f32 %v3415_v15, %v3084_v0  ;;  %v3086_v53 = vpop.f32.mrb[1].mxu1 }
 0x418   : > { %v3087_v33 = vpop.f32.mrb[2].mxu1 }
 0x419   : > { %v3099_v37 = vmax.f32 %v3085_v43, 0.0  ;;  %v3088_v35 = vadd.f32 %v3415_v15, %v3087_v33  ;;  %v3089_v55 = vpop.f32.mrb[3].mxu1 }
 0x41b   : > { %v3107_v47 = vcombine.high %v3099_v37, %v3099_v37  ;;  %v3116_v10 = vsel %vm3115_vm3, %v3099_v37, 0.0  ;;  %v3100_v1 = vmax.f32 %v3088_v35, 0.0 }
 0x41c   : > { %v3117_v22 = vrot.slane %v3116_v10, 4 }
 0x41d   : > { %v3123_v45 = vsel %vm3115_vm3, %v3107_v47, 0.0  ;;  %v3108_v25 = vcombine.high %v3100_v1, %v3100_v1  ;;  %v3130_v29 = vsel %vm3115_vm3, %v3100_v1, 0.0 }
 0x41e   : > { %v3118_v21 = vadd.f32 %v3117_v22, %v3116_v10  ;;  %v3124_v60 = vrot.slane %v3123_v45, 4  ;;  %v3131_v48 = vrot.slane %v3130_v29, 4 }
 0x41f   : > { %v3137_v17 = vsel %vm3115_vm3, %v3108_v25, 0.0 }
 0x420   : > { %v3119_v32 = vrot.slane %v3118_v21, 2  ;;  %v3125_v49 = vadd.f32 %v3124_v60, %v3123_v45  ;;  %v3132_v5 = vadd.f32 %v3131_v48, %v3130_v29  ;;  %v3138_v31 = vrot.slane %v3137_v17, 4 }
 0x422   : > { %v3120_v16 = vadd.f32 %v3119_v32, %v3118_v21  ;;  %v3126_v4 = vrot.slane %v3125_v49, 2  ;;  %v3133_v52 = vrot.slane %v3132_v5, 2  ;;  %v3139_v46 = vadd.f32 %v3138_v31, %v3137_v17 }
 0x424   : > { %v3121_v51 = vrot.slane %v3120_v16, 1  ;;  %v3127_v7 = vadd.f32 %v3126_v4, %v3125_v49  ;;  %v3134_v23 = vadd.f32 %v3133_v52, %v3132_v5  ;;  %v3140_v27 = vrot.slane %v3139_v46, 2 }
 0x426   : > { %v3122_v3 = vadd.f32 %v3121_v51, %v3120_v16  ;;  %v3128_v30 = vrot.slane %v3127_v7, 1  ;;  %v3135_v40 = vrot.slane %v3134_v23, 1  ;;  %v3141_v12 = vadd.f32 %v3140_v27, %v3139_v46 }
 0x428   : > { %v3129_v44 = vadd.f32 %v3128_v30, %v3127_v7  ;;  %v3172_v26 = vpack.c.bf16 %v3122_v3, %v3122_v3  ;;  %v3136_v61 = vadd.f32 %v3135_v40, %v3134_v23  ;;  %v3142_v58 = vrot.slane %v3141_v12, 1 }
 0x42a   : > { %v3173_v36 = vpack.c.bf16 %v3129_v44, %v3129_v44  ;;  %v3143_v19 = vadd.f32 %v3142_v58, %v3141_v12  ;;  %v3174_v18 = vpack.c.bf16 %v3136_v61, %v3136_v61  ;;  %v3211_v62 = vunpack.c.l.b16 %v3172_v26  ;;  %v3430_v61 = vld [vmem:[%s5092_s8] ss:$0 sm:$0xff] }
 0x42c   : > { %v3212_v39 = vunpack.c.l.b16 %v3173_v36  ;;  %v3175_v41 = vpack.c.bf16 %v3143_v19, %v3143_v19  ;;  %v3213_v42 = vunpack.c.l.b16 %v3174_v18 }
 0x42e   : > { %v3219_v56 = vsel %vm2043_vm4, %v3212_v39, %v3211_v62  ;;  %v3214_v2 = vunpack.c.l.b16 %v3175_v41 }
 0x42f   : > { %v3220_v28 = vsel %vm2045_vm5, %v3213_v42, %v3219_v56 }
 0x430   : > { %v3221_v6 = vsel %vm2047_vm7, %v3214_v2, %v3220_v28 }
 0x43e   : > { %v3092_v13 = vpop.f32.mrb[4].mxu1 }
 0x43f   : > { %v3093_v20 = vadd.f32 %v3415_v15, %v3092_v13  ;;  %v3094_v11 = vpop.f32.mrb[5].mxu1 }
 0x440   : > { %v3095_v34 = vpop.f32.mrb[6].mxu1 }
 0x441   : > { %v3101_v54 = vmax.f32 %v3093_v20, 0.0  ;;  %v3096_v9 = vadd.f32 %v3415_v15, %v3095_v34  ;;  %v3097_v24 = vpop.f32.mrb[7].mxu1 }
 0x443   : > { %v3109_v50 = vcombine.high %v3101_v54, %v3101_v54  ;;  %v3144_v57 = vsel %vm3115_vm3, %v3101_v54, 0.0  ;;  %v3102_v8 = vmax.f32 %v3096_v9, 0.0 }
 0x444   : > { %v3145_v14 = vrot.slane %v3144_v57, 4 }
 0x445   : > { %v3151_v63 = vsel %vm3115_vm3, %v3109_v50, 0.0  ;;  %v3110_v59 = vcombine.high %v3102_v8, %v3102_v8  ;;  %v3158_v38 = vsel %vm3115_vm3, %v3102_v8, 0.0 }
 0x446   : > { %v3146_v0 = vadd.f32 %v3145_v14, %v3144_v57  ;;  %v3152_v43 = vrot.slane %v3151_v63, 4  ;;  %v3159_v53 = vrot.slane %v3158_v38, 4 }
 0x447   : > { %v3165_v33 = vsel %vm3115_vm3, %v3110_v59, 0.0 }
 0x448   : > { %v3147_v37 = vrot.slane %v3146_v0, 2  ;;  %v3153_v35 = vadd.f32 %v3152_v43, %v3151_v63  ;;  %v3160_v55 = vadd.f32 %v3159_v53, %v3158_v38  ;;  %v3166_v15 = vrot.slane %v3165_v33, 4 }
 0x44a   : > { %v3148_v47 = vadd.f32 %v3147_v37, %v3146_v0  ;;  %v3154_v10 = vrot.slane %v3153_v35, 2  ;;  %v3161_v1 = vrot.slane %v3160_v55, 2  ;;  %v3167_v22 = vadd.f32 %v3166_v15, %v3165_v33 }
 0x44c   : > { %v3149_v45 = vrot.slane %v3148_v47, 1  ;;  %v3155_v25 = vadd.f32 %v3154_v10, %v3153_v35  ;;  %v3162_v29 = vadd.f32 %v3161_v1, %v3160_v55  ;;  %v3168_v21 = vrot.slane %v3167_v22, 2 }
 0x44e   : > { %v3150_v60 = vadd.f32 %v3149_v45, %v3148_v47  ;;  %v3156_v48 = vrot.slane %v3155_v25, 1  ;;  %v3163_v17 = vrot.slane %v3162_v29, 1  ;;  %v3169_v32 = vadd.f32 %v3168_v21, %v3167_v22 }
 0x450   : > { %v3157_v49 = vadd.f32 %v3156_v48, %v3155_v25  ;;  %v3176_v5 = vpack.c.bf16 %v3150_v60, %v3150_v60  ;;  %v3164_v31 = vadd.f32 %v3163_v17, %v3162_v29  ;;  %v3170_v16 = vrot.slane %v3169_v32, 1 }
 0x452   : > { %v3177_v4 = vpack.c.bf16 %v3157_v49, %v3157_v49  ;;  %v3215_v52 = vunpack.c.l.b16 %v3176_v5  ;;  %v3171_v46 = vadd.f32 %v3170_v16, %v3169_v32  ;;  %v3178_v51 = vpack.c.bf16 %v3164_v31, %v3164_v31 }
 0x454   : > { %v3216_v7 = vunpack.c.l.b16 %v3177_v4  ;;  %v3222_v23 = vsel %vm2049_vm8, %v3215_v52, %v3221_v6  ;;  %v3179_v27 = vpack.c.bf16 %v3171_v46, %v3171_v46  ;;  %v3217_v3 = vunpack.c.l.b16 %v3178_v51 }
 0x456   : > { %v3223_v30 = vsel %vm2051_vm9, %v3216_v7, %v3222_v23  ;;  %v3218_v40 = vunpack.c.l.b16 %v3179_v27 }
 0x457   : > { %v3224_v12 = vsel %vm2053_vm10, %v3217_v3, %v3223_v30 }
 0x458   : > { %v3225_v44 = vsel %vm2055_vm11, %v3218_v40, %v3224_v12 }
 0x459   : > { %v3226_v26 = vpack.c.b16 %v3225_v44, %v3225_v44 }
 0x45b   : > { %3499 = vmatmul.mubr.bf16.vlgmr.msra.gmra.mrb[8].mxu0 %v3226_v26 }
 0x52e   : > { %v3310_v58 = vpop.f32.mrb[8].mxu0 }
 0x52f   : > { %v3311_v36 = vadd.f32 %v3430_v61, %v3310_v58  ;;  %v3500_v19 = vpop.f32.mrb[9].mxu0 }
 0x530   : > { %v3313_v18 = vpop.f32.mrb[10].mxu0 }
 0x531   : > { %v3501_v62 = vpop.f32.mrb[11].mxu0  ;;  %v3316_v39 = vmul.f32 %v3311_v36, %v3311_v36 }
 0x533   : > { %3317 = vadd.xlane.f32.xlu0 %v3316_v39 }
 0x5c0   : > { %v3318_v41 = vpop.xlane.xlu0 %3317 }
 0x5c1   : > { %v3319_v42 = vmax.f32 %v3318_v41, 1e-24 }
 0x5c3   : > { %3625 = vrsqrt.f32 %v3319_v42 }
 0x5cd   : > { %v3626_v56 = vpop.eup %3625 }
 0x5ce   : > { %v3321_v2 = vmul.f32 %v3626_v56, %v3311_v36 }
 0x5d0   : > { %3322 = vst [vmem:[%s326_s25] sm:$0xff] %v3321_v2 }
 0x5d1   : > { %3641 = shalt.err (!%p3638_p3)
}
 0x5d2   : > { %s3642_s22 = scalar_lea.hbm %s5042_s28, 128  ;;  %s3646_s25 = scalar_lea.hbm %s5093_s9, 256 }
 0x5d3   : > { %p3643_p4 = scmp.ne.s32.totalorder %s5042_s28, %s3642_s22  ;;  %p3647_p9 = scmp.lt.u32.totalorder %s5042_s28, %s5093_s9 }
 0x5d4   : > { %p3648_p10 = scmp.lt.u32.totalorder %s3646_s25, %s3642_s22  ;;  %p3650_p12 = scmp.lt.u32.totalorder %s3642_s22, %s5042_s28 }
 0x5d5   : > { %p3644_p7 = pnand %p3643_p4, %p3787_p5 }
 0x5d6   : > { %p3649_p11 = por %p3648_p10, %p3647_p9 }
 0x5d7   : > { %p3645_p8 = pneg %p3644_p7 }
 0x5d8   : > { %p3651_p13 = por %p3650_p12, %p3649_p11 }
 0x5da   : > { %p3652_p0 = pnand %p3651_p13, %p3645_p8 }
 0x5dc   : > { %3655 = shalt.err (!%p3652_p0)
}
 0x5dd   : > { %3502 = dma.vmem_to_hbm [thread:$0]  (%p3787_p5), %s5044_s21, 128, %s5042_s28, %s3324_s29  }
 0x5de PF: > { %p3508_p1 = scmp.ge.s32.totalorder %s3690_s12, 2  ;;  %s3349_s14 = sand.u32 1, %s3678_s30  }
 0x5df   : > { %s3350_s13 = scalar_lea.sflag [#allocation3], %s3349_s14 }
 0x5e0   : > { %p3505_p2 = pnand %p3508_p1, %p3791_p6 }
 0x5e2   : > { %3673 = dma.done.wait (!%p3505_p2), %s3350_s13, 128  }
 0x5e3   : > { %3675 = vsyncadd (!%p3505_p2), %s3350_s13, 4294967168  ;;  %p19_p3 = scmp.ge.s32.totalorder %s3774_s15, 4   ;;  %s5212_s30 = smov %s3682_s10 }
 0x5e4   : > { %s5213_s10 = smov %s3686_s11  ;;  %s5214_s11 = smov %s3785_s18 }
 0x5e5   : > { %s5215_s12 = smov %s3774_s15  ;;  %21 = sbr.rel (!%p19_p3) target bundleno = 3 (0x3), region = 91 }
 0x5ec   :  { %3355 = vsyncpa [#allocation3], 1 }
 0x5ed   :  { %3357 = vsyncpa [#allocation3 + $0x1], 1 }

</bundles_post_ra>
